<compile_context>
chip_gen: v6e
topology: v6e:2x2x1
jax: 0.10.0
libtpu: 0.0.40
codegen_flags: <defaults>
</compile_context>

<pallas_src>
import numpy as np
import jax
import jax.numpy as jnp
from jax import lax
from jax.experimental import pallas as pl
from jax.experimental.pallas import tpu as pltpu


def _round_up(x, m):
    return ((x + m - 1) // m) * m


def decoder_kernel(embf_ref, h0_ref, wihx_ref, wihh_ref, whh_ref, bih_ref, bhh_ref,
                   waffg_ref, waffh_ref, baff_ref,
                   logits_ref, rh_ref, gates_scr, gru_scr):
    T, BP, _ = gates_scr.shape
    HP = h0_ref.shape[-1]
    VP = logits_ref.shape[-1]

    h0 = h0_ref[...]                                                   # (BP, HP), pads == 0

    # Input-path gate pre-activations for all timesteps (one MXU matmul), plus the h0-dependent
    # input-gate term + input bias, which is constant over t (added once, outside the loop).
    gx_all = jnp.dot(embf_ref[...], wihx_ref[...],
                     preferred_element_type=jnp.float32)               # (T*BP, 3*HP)
    gh0 = jnp.dot(h0, wihh_ref[...],
                  preferred_element_type=jnp.float32) + bih_ref[...]   # (BP, 3*HP)
    gates_scr[...] = gx_all.reshape(T, BP, 3 * HP) + gh0[None]

    h = h0
    for t in range(T):        # T is static & tiny: fully unrolled, static ref indices
        gx = gates_scr[t]                                              # (BP, 3*HP) full tiles
        # Re-read whh/bhh from VMEM each step (cheap vld) rather than holding them live in
        # vregs across the whole unrolled recurrence.
        gh = jnp.dot(h, whh_ref[...],
                     preferred_element_type=jnp.float32) + bhh_ref[...]
        r = jax.nn.sigmoid(gx[:, 0:HP] + gh[:, 0:HP])                  # whole-vreg gate slices
        z = jax.nn.sigmoid(gx[:, HP:2 * HP] + gh[:, HP:2 * HP])
        n = jnp.tanh(gx[:, 2 * HP:3 * HP] + r * gh[:, 2 * HP:3 * HP])
        h = (1.0 - z) * n + z * h
        gru_scr[t] = h

    rh_ref[...] = h

    # Output projection: gru_out @ Wg + (h0 @ Wh + b) -- no concat, lane-dense VP columns.
    proj = jnp.dot(gru_scr[...].reshape(T * BP, HP), waffg_ref[...],
                   preferred_element_type=jnp.float32)                 # (T*BP, VP)
    h0_aff = jnp.dot(h0, waffh_ref[...],
                     preferred_element_type=jnp.float32) + baff_ref[...]   # (BP, VP)
    logits_ref[...] = proj.reshape(T, BP, VP) + h0_aff[None]


@jax.jit
def decoder_forward(x_idx, h, params):
    emb_table = params["emb"]
    B, T = x_idx.shape
    V, E = emb_table.shape
    H = h.shape[-1]
    HP = _round_up(H, 128)              # per-gate lane width, padded to full vregs
    VP = _round_up(V, 128)              # lane-dense logits store
    BP = _round_up(max(B, 8), 8)        # sublane-padded batch -> full (8,128) tiles

    # ---- wrapper-side layout plumbing (free relative to the kernel) ----
    emb_t = jnp.transpose(emb_table[x_idx].astype(jnp.float32), (1, 0, 2))    # (T, B, E)
    emb_tp = jnp.zeros((T, BP, E), jnp.float32).at[:, :B, :].set(emb_t)
    emb_flat = emb_tp.reshape(T * BP, E)                                      # (T*BP, E)

    h0 = h[-1].astype(jnp.float32)                                            # (B, H)
    h0_p = jnp.zeros((BP, HP), jnp.float32).at[:B, :H].set(h0)

    def pad_gate_cols(w, rows=None):
        # (K, 3H) -> (Kp, 3*HP): each gate's H columns placed at a 128-lane boundary, rest zero.
        K = w.shape[0]
        Kp = K if rows is None else rows
        out = jnp.zeros((Kp, 3 * HP), jnp.float32)
        for g in range(3):
            out = out.at[:K, g * HP:g * HP + H].set(w[:, g * H:(g + 1) * H])
        return out

    w_ih, w_hh = params["w_ih"], params["w_hh"]       # (E+H, 3H), (H, 3H), gate order [r|z|n]
    wihx_p = pad_gate_cols(w_ih[:E])                  # (E, 3HP)
    wihh_p = pad_gate_cols(w_ih[E:], rows=HP)         # (HP, 3HP), zero rows past H
    whh_p = pad_gate_cols(w_hh, rows=HP)              # (HP, 3HP)
    bih_p = pad_gate_cols(params["b_ih"])             # (1, 3HP)
    bhh_p = pad_gate_cols(params["b_hh"])             # (1, 3HP)

    w_aff, b_aff = params["w_aff"], params["b_aff"]   # (2H, V), (1, V)
    waffg_p = jnp.zeros((HP, VP), jnp.float32).at[:H, :V].set(w_aff[:H])
    waffh_p = jnp.zeros((HP, VP), jnp.float32).at[:H, :V].set(w_aff[H:])
    baff_p = jnp.zeros((1, VP), jnp.float32).at[:, :V].set(b_aff)

    vspec = pl.BlockSpec(memory_space=pltpu.MemorySpace.VMEM)
    logits_p, rh_p = pl.pallas_call(
        decoder_kernel,
        out_shape=(jax.ShapeDtypeStruct((T, BP, VP), jnp.float32),
                   jax.ShapeDtypeStruct((BP, HP), jnp.float32)),
        in_specs=[vspec] * 10,
        out_specs=(vspec, vspec),
        scratch_shapes=[pltpu.VMEM((T, BP, 3 * HP), jnp.float32),   # staged gate pre-activations
                        pltpu.VMEM((T, BP, HP), jnp.float32)],      # per-step hidden states
    )(emb_flat, h0_p, wihx_p, wihh_p, whh_p, bih_p, bhh_p, waffg_p, waffh_p, baff_p)

    logits = jnp.transpose(logits_p, (1, 0, 2))[:B, :, :V]          # (B, T, V)
    rh = rh_p[:B, :H]                                               # (B, H)
    return logits, rh[None]                                         # r_h as (1, B, H) like PyTorch


def decoder_ref(x_idx, h, params):
    """Pure-JAX reference (matches PyTorch eval-mode Decoder.forward)."""
    emb = params["emb"][x_idx]
    B, T, _ = emb.shape
    H = h.shape[-1]
    h0 = h[-1]
    h_rep = jnp.broadcast_to(h0[:, None, :], (B, T, H))
    x_cat = jnp.concatenate([emb, h_rep], axis=-1)

    def step(hh, xt):
        gx = xt @ params["w_ih"] + params["b_ih"][0]
        gh = hh @ params["w_hh"] + params["b_hh"][0]
        r = jax.nn.sigmoid(gx[:, :H] + gh[:, :H])
        z = jax.nn.sigmoid(gx[:, H:2 * H] + gh[:, H:2 * H])
        n = jnp.tanh(gx[:, 2 * H:] + r * gh[:, 2 * H:])
        hn = (1.0 - z) * n + z * hh
        return hn, hn

    h_final, ys = lax.scan(step, h0, jnp.transpose(x_cat, (1, 0, 2)))
    gru_out = jnp.transpose(ys, (1, 0, 2))
    cat2 = jnp.concatenate([gru_out, h_rep], axis=-1)
    logits = cat2 @ params["w_aff"] + params["b_aff"][0]
    return logits, h_final[None]


def init_params(key, emb_hidden, dest_voc_size, hidden_size):
    E, V, H = emb_hidden, dest_voc_size, hidden_size
    D = E + H
    ks = jax.random.split(key, 7)
    s = 0.1
    return dict(
        emb=jax.random.normal(ks[0], (V, E), jnp.float32) * s,
        w_ih=jax.random.normal(ks[1], (D, 3 * H), jnp.float32) * s,   # [r|z|n] gate order
        w_hh=jax.random.normal(ks[2], (H, 3 * H), jnp.float32) * s,
        b_ih=jax.random.normal(ks[3], (1, 3 * H), jnp.float32) * s,
        b_hh=jax.random.normal(ks[4], (1, 3 * H), jnp.float32) * s,
        w_aff=jax.random.normal(ks[5], (2 * H, V), jnp.float32) * s,
        b_aff=jax.random.normal(ks[6], (1, V), jnp.float32) * s,
    )


if __name__ == "__main__":
    # Small shapes consistent with the module: emb_hidden=32, hidden_size=32, dest_voc_size=64
    E, V, H = 32, 64, 32
    B, T = 2, 8

    key = jax.random.PRNGKey(0)
    kp, kx, kh = jax.random.split(key, 3)
    params = init_params(kp, E, V, H)
    x_idx = jax.random.randint(kx, (B, T), 0, V, dtype=jnp.int32)
    h = jax.random.normal(kh, (1, B, H), jnp.float32)

    logits, rh = decoder_forward(x_idx, h, params)
    jax.block_until_ready((logits, rh))

    ref_logits, ref_rh = decoder_ref(x_idx, h, params)
    assert logits.shape == (B, T, V) and rh.shape == (1, B, H)
    assert np.allclose(np.asarray(logits), np.asarray(ref_logits), atol=1e-4, rtol=1e-4)
    assert np.allclose(np.asarray(rh), np.asarray(ref_rh), atol=1e-4, rtol=1e-4)
    print("KERNEL_OK")
</pallas_src>

<mosaic_0001>
module attributes {stable_mosaic.version = 11 : i64} {
  func.func @decoder_kernel(%arg0: memref<64x32xf32, #tpu.memory_space<vmem>>, %arg1: memref<8x128xf32, #tpu.memory_space<vmem>>, %arg2: memref<32x384xf32, #tpu.memory_space<vmem>>, %arg3: memref<128x384xf32, #tpu.memory_space<vmem>>, %arg4: memref<128x384xf32, #tpu.memory_space<vmem>>, %arg5: memref<1x384xf32, #tpu.memory_space<vmem>>, %arg6: memref<1x384xf32, #tpu.memory_space<vmem>>, %arg7: memref<128x128xf32, #tpu.memory_space<vmem>>, %arg8: memref<128x128xf32, #tpu.memory_space<vmem>>, %arg9: memref<1x128xf32, #tpu.memory_space<vmem>>, %arg10: memref<8x8x128xf32, #tpu.memory_space<vmem>>, %arg11: memref<8x128xf32, #tpu.memory_space<vmem>>, %arg12: memref<8x8x384xf32, #tpu.memory_space<vmem>>, %arg13: memref<8x8x128xf32, #tpu.memory_space<vmem>>) attributes {dimension_semantics = [], scalar_prefetch = 0 : i64, scratch_operands = 2 : i64, tpu.core_type = #tpu.core_type<tc>} {
    %c0 = arith.constant 0 : index
    %c0_0 = arith.constant 0 : index
    %0 = vector.load %arg1[%c0, %c0_0] : memref<8x128xf32, #tpu.memory_space<vmem>>, vector<8x128xf32>
    %c0_1 = arith.constant 0 : index
    %c0_2 = arith.constant 0 : index
    %1 = vector.load %arg0[%c0_1, %c0_2] : memref<64x32xf32, #tpu.memory_space<vmem>>, vector<64x32xf32>
    %c0_3 = arith.constant 0 : index
    %c0_4 = arith.constant 0 : index
    %2 = vector.load %arg2[%c0_3, %c0_4] : memref<32x384xf32, #tpu.memory_space<vmem>>, vector<32x384xf32>
    %cst = arith.constant dense<0.000000e+00> : vector<64x384xf32>
    %3 = tpu.matmul %1, %2, %cst {dimension_numbers = #tpu.dot_dimension_numbers<[1], [0], [0], [1], [0, 0, 1, 1], [], []>} : vector<64x32xf32>, vector<32x384xf32>, vector<64x384xf32> -> vector<64x384xf32>
    %c0_5 = arith.constant 0 : index
    %c0_6 = arith.constant 0 : index
    %4 = vector.load %arg3[%c0_5, %c0_6] : memref<128x384xf32, #tpu.memory_space<vmem>>, vector<128x384xf32>
    %cst_7 = arith.constant dense<0.000000e+00> : vector<8x384xf32>
    %5 = tpu.matmul %0, %4, %cst_7 {dimension_numbers = #tpu.dot_dimension_numbers<[1], [0], [0], [1], [0, 0, 1, 1], [], []>} : vector<8x128xf32>, vector<128x384xf32>, vector<8x384xf32> -> vector<8x384xf32>
    %c0_8 = arith.constant 0 : index
    %c0_9 = arith.constant 0 : index
    %6 = vector.load %arg5[%c0_8, %c0_9] : memref<1x384xf32, #tpu.memory_space<vmem>>, vector<1x384xf32>
    %7 = vector.broadcast %6 : vector<1x384xf32> to vector<8x384xf32>
    %8 = arith.addf %5, %7 : vector<8x384xf32>
    %9 = vector.shape_cast %3 : vector<64x384xf32> to vector<8x8x384xf32>
    %10 = vector.shape_cast %8 : vector<8x384xf32> to vector<1x8x384xf32>
    %11 = vector.broadcast %10 : vector<1x8x384xf32> to vector<8x8x384xf32>
    %12 = arith.addf %9, %11 : vector<8x8x384xf32>
    %c0_10 = arith.constant 0 : index
    %c0_11 = arith.constant 0 : index
    %c0_12 = arith.constant 0 : index
    %13 = vector.load %arg12[%c0_10, %c0_11, %c0_12] : memref<8x8x384xf32, #tpu.memory_space<vmem>>, vector<8x8x384xf32>
    tpu.vector_store %arg12[%c0_10, %c0_11, %c0_12], %12 {strides = array<i32>} : memref<8x8x384xf32, #tpu.memory_space<vmem>>, vector<8x8x384xf32>,
    %c0_13 = arith.constant 0 : index
    %c0_14 = arith.constant 0 : index
    %c0_15 = arith.constant 0 : index
    %14 = vector.load %arg12[%c0_13, %c0_14, %c0_15] : memref<8x8x384xf32, #tpu.memory_space<vmem>>, vector<1x8x384xf32>
    %15 = vector.shape_cast %14 : vector<1x8x384xf32> to vector<8x384xf32>
    %c0_16 = arith.constant 0 : index
    %c0_17 = arith.constant 0 : index
    %16 = vector.load %arg4[%c0_16, %c0_17] : memref<128x384xf32, #tpu.memory_space<vmem>>, vector<128x384xf32>
    %cst_18 = arith.constant dense<0.000000e+00> : vector<8x384xf32>
    %17 = tpu.matmul %0, %16, %cst_18 {dimension_numbers = #tpu.dot_dimension_numbers<[1], [0], [0], [1], [0, 0, 1, 1], [], []>} : vector<8x128xf32>, vector<128x384xf32>, vector<8x384xf32> -> vector<8x384xf32>
    %c0_19 = arith.constant 0 : index
    %c0_20 = arith.constant 0 : index
    %18 = vector.load %arg6[%c0_19, %c0_20] : memref<1x384xf32, #tpu.memory_space<vmem>>, vector<1x384xf32>
    %19 = vector.broadcast %18 : vector<1x384xf32> to vector<8x384xf32>
    %20 = arith.addf %17, %19 : vector<8x384xf32>
    %21 = vector.extract_strided_slice %15 {offsets = [0, 0], sizes = [8, 128], strides = [1, 1]} : vector<8x384xf32> to vector<8x128xf32>
    %22 = vector.extract_strided_slice %20 {offsets = [0, 0], sizes = [8, 128], strides = [1, 1]} : vector<8x384xf32> to vector<8x128xf32>
    %23 = arith.addf %21, %22 : vector<8x128xf32>
    %24 = arith.negf %23 : vector<8x128xf32>
    %25 = math.exp %24 : vector<8x128xf32>
    %cst_21 = arith.constant 1.000000e+00 : f32
    %26 = vector.broadcast %cst_21 : f32 to vector<8x128xf32>
    %27 = arith.addf %26, %25 : vector<8x128xf32>
    %28 = arith.divf %26, %27 : vector<8x128xf32>
    %29 = vector.extract_strided_slice %15 {offsets = [0, 128], sizes = [8, 128], strides = [1, 1]} : vector<8x384xf32> to vector<8x128xf32>
    %30 = vector.extract_strided_slice %20 {offsets = [0, 128], sizes = [8, 128], strides = [1, 1]} : vector<8x384xf32> to vector<8x128xf32>
    %31 = arith.addf %29, %30 : vector<8x128xf32>
    %32 = arith.negf %31 : vector<8x128xf32>
    %33 = math.exp %32 : vector<8x128xf32>
    %cst_22 = arith.constant 1.000000e+00 : f32
    %34 = vector.broadcast %cst_22 : f32 to vector<8x128xf32>
    %35 = arith.addf %34, %33 : vector<8x128xf32>
    %36 = arith.divf %34, %35 : vector<8x128xf32>
    %37 = vector.extract_strided_slice %15 {offsets = [0, 256], sizes = [8, 128], strides = [1, 1]} : vector<8x384xf32> to vector<8x128xf32>
    %38 = vector.extract_strided_slice %20 {offsets = [0, 256], sizes = [8, 128], strides = [1, 1]} : vector<8x384xf32> to vector<8x128xf32>
    %39 = arith.mulf %28, %38 : vector<8x128xf32>
    %40 = arith.addf %37, %39 : vector<8x128xf32>
    %41 = math.tanh %40 : vector<8x128xf32>
    %cst_23 = arith.constant 1.000000e+00 : f32
    %42 = vector.broadcast %cst_23 : f32 to vector<8x128xf32>
    %43 = arith.subf %42, %36 : vector<8x128xf32>
    %44 = arith.mulf %43, %41 : vector<8x128xf32>
    %45 = arith.mulf %36, %0 : vector<8x128xf32>
    %46 = arith.addf %44, %45 : vector<8x128xf32>
    %c0_24 = arith.constant 0 : index
    %c0_25 = arith.constant 0 : index
    %c0_26 = arith.constant 0 : index
    %47 = vector.load %arg13[%c0_24, %c0_25, %c0_26] : memref<8x8x128xf32, #tpu.memory_space<vmem>>, vector<1x8x128xf32>
    %48 = vector.shape_cast %47 : vector<1x8x128xf32> to vector<8x128xf32>
    %49 = vector.shape_cast %46 : vector<8x128xf32> to vector<1x8x128xf32>
    tpu.vector_store %arg13[%c0_24, %c0_25, %c0_26], %49 {strides = array<i32>} : memref<8x8x128xf32, #tpu.memory_space<vmem>>, vector<1x8x128xf32>,
    %c1 = arith.constant 1 : index
    %c0_27 = arith.constant 0 : index
    %c0_28 = arith.constant 0 : index
    %50 = vector.load %arg12[%c1, %c0_27, %c0_28] : memref<8x8x384xf32, #tpu.memory_space<vmem>>, vector<1x8x384xf32>
    %51 = vector.shape_cast %50 : vector<1x8x384xf32> to vector<8x384xf32>
    %c0_29 = arith.constant 0 : index
    %c0_30 = arith.constant 0 : index
    %52 = vector.load %arg4[%c0_29, %c0_30] : memref<128x384xf32, #tpu.memory_space<vmem>>, vector<128x384xf32>
    %cst_31 = arith.constant dense<0.000000e+00> : vector<8x384xf32>
    %53 = tpu.matmul %46, %52, %cst_31 {dimension_numbers = #tpu.dot_dimension_numbers<[1], [0], [0], [1], [0, 0, 1, 1], [], []>} : vector<8x128xf32>, vector<128x384xf32>, vector<8x384xf32> -> vector<8x384xf32>
    %c0_32 = arith.constant 0 : index
    %c0_33 = arith.constant 0 : index
    %54 = vector.load %arg6[%c0_32, %c0_33] : memref<1x384xf32, #tpu.memory_space<vmem>>, vector<1x384xf32>
    %55 = vector.broadcast %54 : vector<1x384xf32> to vector<8x384xf32>
    %56 = arith.addf %53, %55 : vector<8x384xf32>
    %57 = vector.extract_strided_slice %51 {offsets = [0, 0], sizes = [8, 128], strides = [1, 1]} : vector<8x384xf32> to vector<8x128xf32>
    %58 = vector.extract_strided_slice %56 {offsets = [0, 0], sizes = [8, 128], strides = [1, 1]} : vector<8x384xf32> to vector<8x128xf32>
    %59 = arith.addf %57, %58 : vector<8x128xf32>
    %60 = arith.negf %59 : vector<8x128xf32>
    %61 = math.exp %60 : vector<8x128xf32>
    %cst_34 = arith.constant 1.000000e+00 : f32
    %62 = vector.broadcast %cst_34 : f32 to vector<8x128xf32>
    %63 = arith.addf %62, %61 : vector<8x128xf32>
    %64 = arith.divf %62, %63 : vector<8x128xf32>
    %65 = vector.extract_strided_slice %51 {offsets = [0, 128], sizes = [8, 128], strides = [1, 1]} : vector<8x384xf32> to vector<8x128xf32>
    %66 = vector.extract_strided_slice %56 {offsets = [0, 128], sizes = [8, 128], strides = [1, 1]} : vector<8x384xf32> to vector<8x128xf32>
    %67 = arith.addf %65, %66 : vector<8x128xf32>
    %68 = arith.negf %67 : vector<8x128xf32>
    %69 = math.exp %68 : vector<8x128xf32>
    %cst_35 = arith.constant 1.000000e+00 : f32
    %70 = vector.broadcast %cst_35 : f32 to vector<8x128xf32>
    %71 = arith.addf %70, %69 : vector<8x128xf32>
    %72 = arith.divf %70, %71 : vector<8x128xf32>
    %73 = vector.extract_strided_slice %51 {offsets = [0, 256], sizes = [8, 128], strides = [1, 1]} : vector<8x384xf32> to vector<8x128xf32>
    %74 = vector.extract_strided_slice %56 {offsets = [0, 256], sizes = [8, 128], strides = [1, 1]} : vector<8x384xf32> to vector<8x128xf32>
    %75 = arith.mulf %64, %74 : vector<8x128xf32>
    %76 = arith.addf %73, %75 : vector<8x128xf32>
    %77 = math.tanh %76 : vector<8x128xf32>
    %cst_36 = arith.constant 1.000000e+00 : f32
    %78 = vector.broadcast %cst_36 : f32 to vector<8x128xf32>
    %79 = arith.subf %78, %72 : vector<8x128xf32>
    %80 = arith.mulf %79, %77 : vector<8x128xf32>
    %81 = arith.mulf %72, %46 : vector<8x128xf32>
    %82 = arith.addf %80, %81 : vector<8x128xf32>
    %c1_37 = arith.constant 1 : index
    %c0_38 = arith.constant 0 : index
    %c0_39 = arith.constant 0 : index
    %83 = vector.load %arg13[%c1_37, %c0_38, %c0_39] : memref<8x8x128xf32, #tpu.memory_space<vmem>>, vector<1x8x128xf32>
    %84 = vector.shape_cast %83 : vector<1x8x128xf32> to vector<8x128xf32>
    %85 = vector.shape_cast %82 : vector<8x128xf32> to vector<1x8x128xf32>
    tpu.vector_store %arg13[%c1_37, %c0_38, %c0_39], %85 {strides = array<i32>} : memref<8x8x128xf32, #tpu.memory_space<vmem>>, vector<1x8x128xf32>,
    %c2 = arith.constant 2 : index
    %c0_40 = arith.constant 0 : index
    %c0_41 = arith.constant 0 : index
    %86 = vector.load %arg12[%c2, %c0_40, %c0_41] : memref<8x8x384xf32, #tpu.memory_space<vmem>>, vector<1x8x384xf32>
    %87 = vector.shape_cast %86 : vector<1x8x384xf32> to vector<8x384xf32>
    %c0_42 = arith.constant 0 : index
    %c0_43 = arith.constant 0 : index
    %88 = vector.load %arg4[%c0_42, %c0_43] : memref<128x384xf32, #tpu.memory_space<vmem>>, vector<128x384xf32>
    %cst_44 = arith.constant dense<0.000000e+00> : vector<8x384xf32>
    %89 = tpu.matmul %82, %88, %cst_44 {dimension_numbers = #tpu.dot_dimension_numbers<[1], [0], [0], [1], [0, 0, 1, 1], [], []>} : vector<8x128xf32>, vector<128x384xf32>, vector<8x384xf32> -> vector<8x384xf32>
    %c0_45 = arith.constant 0 : index
    %c0_46 = arith.constant 0 : index
    %90 = vector.load %arg6[%c0_45, %c0_46] : memref<1x384xf32, #tpu.memory_space<vmem>>, vector<1x384xf32>
    %91 = vector.broadcast %90 : vector<1x384xf32> to vector<8x384xf32>
    %92 = arith.addf %89, %91 : vector<8x384xf32>
    %93 = vector.extract_strided_slice %87 {offsets = [0, 0], sizes = [8, 128], strides = [1, 1]} : vector<8x384xf32> to vector<8x128xf32>
    %94 = vector.extract_strided_slice %92 {offsets = [0, 0], sizes = [8, 128], strides = [1, 1]} : vector<8x384xf32> to vector<8x128xf32>
    %95 = arith.addf %93, %94 : vector<8x128xf32>
    %96 = arith.negf %95 : vector<8x128xf32>
    %97 = math.exp %96 : vector<8x128xf32>
    %cst_47 = arith.constant 1.000000e+00 : f32
    %98 = vector.broadcast %cst_47 : f32 to vector<8x128xf32>
    %99 = arith.addf %98, %97 : vector<8x128xf32>
    %100 = arith.divf %98, %99 : vector<8x128xf32>
    %101 = vector.extract_strided_slice %87 {offsets = [0, 128], sizes = [8, 128], strides = [1, 1]} : vector<8x384xf32> to vector<8x128xf32>
    %102 = vector.extract_strided_slice %92 {offsets = [0, 128], sizes = [8, 128], strides = [1, 1]} : vector<8x384xf32> to vector<8x128xf32>
    %103 = arith.addf %101, %102 : vector<8x128xf32>
    %104 = arith.negf %103 : vector<8x128xf32>
    %105 = math.exp %104 : vector<8x128xf32>
    %cst_48 = arith.constant 1.000000e+00 : f32
    %106 = vector.broadcast %cst_48 : f32 to vector<8x128xf32>
    %107 = arith.addf %106, %105 : vector<8x128xf32>
    %108 = arith.divf %106, %107 : vector<8x128xf32>
    %109 = vector.extract_strided_slice %87 {offsets = [0, 256], sizes = [8, 128], strides = [1, 1]} : vector<8x384xf32> to vector<8x128xf32>
    %110 = vector.extract_strided_slice %92 {offsets = [0, 256], sizes = [8, 128], strides = [1, 1]} : vector<8x384xf32> to vector<8x128xf32>
    %111 = arith.mulf %100, %110 : vector<8x128xf32>
    %112 = arith.addf %109, %111 : vector<8x128xf32>
    %113 = math.tanh %112 : vector<8x128xf32>
    %cst_49 = arith.constant 1.000000e+00 : f32
    %114 = vector.broadcast %cst_49 : f32 to vector<8x128xf32>
    %115 = arith.subf %114, %108 : vector<8x128xf32>
    %116 = arith.mulf %115, %113 : vector<8x128xf32>
    %117 = arith.mulf %108, %82 : vector<8x128xf32>
    %118 = arith.addf %116, %117 : vector<8x128xf32>
    %c2_50 = arith.constant 2 : index
    %c0_51 = arith.constant 0 : index
    %c0_52 = arith.constant 0 : index
    %119 = vector.load %arg13[%c2_50, %c0_51, %c0_52] : memref<8x8x128xf32, #tpu.memory_space<vmem>>, vector<1x8x128xf32>
    %120 = vector.shape_cast %119 : vector<1x8x128xf32> to vector<8x128xf32>
    %121 = vector.shape_cast %118 : vector<8x128xf32> to vector<1x8x128xf32>
    tpu.vector_store %arg13[%c2_50, %c0_51, %c0_52], %121 {strides = array<i32>} : memref<8x8x128xf32, #tpu.memory_space<vmem>>, vector<1x8x128xf32>,
    %c3 = arith.constant 3 : index
    %c0_53 = arith.constant 0 : index
    %c0_54 = arith.constant 0 : index
    %122 = vector.load %arg12[%c3, %c0_53, %c0_54] : memref<8x8x384xf32, #tpu.memory_space<vmem>>, vector<1x8x384xf32>
    %123 = vector.shape_cast %122 : vector<1x8x384xf32> to vector<8x384xf32>
    %c0_55 = arith.constant 0 : index
    %c0_56 = arith.constant 0 : index
    %124 = vector.load %arg4[%c0_55, %c0_56] : memref<128x384xf32, #tpu.memory_space<vmem>>, vector<128x384xf32>
    %cst_57 = arith.constant dense<0.000000e+00> : vector<8x384xf32>
    %125 = tpu.matmul %118, %124, %cst_57 {dimension_numbers = #tpu.dot_dimension_numbers<[1], [0], [0], [1], [0, 0, 1, 1], [], []>} : vector<8x128xf32>, vector<128x384xf32>, vector<8x384xf32> -> vector<8x384xf32>
    %c0_58 = arith.constant 0 : index
    %c0_59 = arith.constant 0 : index
    %126 = vector.load %arg6[%c0_58, %c0_59] : memref<1x384xf32, #tpu.memory_space<vmem>>, vector<1x384xf32>
    %127 = vector.broadcast %126 : vector<1x384xf32> to vector<8x384xf32>
    %128 = arith.addf %125, %127 : vector<8x384xf32>
    %129 = vector.extract_strided_slice %123 {offsets = [0, 0], sizes = [8, 128], strides = [1, 1]} : vector<8x384xf32> to vector<8x128xf32>
    %130 = vector.extract_strided_slice %128 {offsets = [0, 0], sizes = [8, 128], strides = [1, 1]} : vector<8x384xf32> to vector<8x128xf32>
    %131 = arith.addf %129, %130 : vector<8x128xf32>
    %132 = arith.negf %131 : vector<8x128xf32>
    %133 = math.exp %132 : vector<8x128xf32>
    %cst_60 = arith.constant 1.000000e+00 : f32
    %134 = vector.broadcast %cst_60 : f32 to vector<8x128xf32>
    %135 = arith.addf %134, %133 : vector<8x128xf32>
    %136 = arith.divf %134, %135 : vector<8x128xf32>
    %137 = vector.extract_strided_slice %123 {offsets = [0, 128], sizes = [8, 128], strides = [1, 1]} : vector<8x384xf32> to vector<8x128xf32>
    %138 = vector.extract_strided_slice %128 {offsets = [0, 128], sizes = [8, 128], strides = [1, 1]} : vector<8x384xf32> to vector<8x128xf32>
    %139 = arith.addf %137, %138 : vector<8x128xf32>
    %140 = arith.negf %139 : vector<8x128xf32>
    %141 = math.exp %140 : vector<8x128xf32>
    %cst_61 = arith.constant 1.000000e+00 : f32
    %142 = vector.broadcast %cst_61 : f32 to vector<8x128xf32>
    %143 = arith.addf %142, %141 : vector<8x128xf32>
    %144 = arith.divf %142, %143 : vector<8x128xf32>
    %145 = vector.extract_strided_slice %123 {offsets = [0, 256], sizes = [8, 128], strides = [1, 1]} : vector<8x384xf32> to vector<8x128xf32>
    %146 = vector.extract_strided_slice %128 {offsets = [0, 256], sizes = [8, 128], strides = [1, 1]} : vector<8x384xf32> to vector<8x128xf32>
    %147 = arith.mulf %136, %146 : vector<8x128xf32>
    %148 = arith.addf %145, %147 : vector<8x128xf32>
    %149 = math.tanh %148 : vector<8x128xf32>
    %cst_62 = arith.constant 1.000000e+00 : f32
    %150 = vector.broadcast %cst_62 : f32 to vector<8x128xf32>
    %151 = arith.subf %150, %144 : vector<8x128xf32>
    %152 = arith.mulf %151, %149 : vector<8x128xf32>
    %153 = arith.mulf %144, %118 : vector<8x128xf32>
    %154 = arith.addf %152, %153 : vector<8x128xf32>
    %c3_63 = arith.constant 3 : index
    %c0_64 = arith.constant 0 : index
    %c0_65 = arith.constant 0 : index
    %155 = vector.load %arg13[%c3_63, %c0_64, %c0_65] : memref<8x8x128xf32, #tpu.memory_space<vmem>>, vector<1x8x128xf32>
    %156 = vector.shape_cast %155 : vector<1x8x128xf32> to vector<8x128xf32>
    %157 = vector.shape_cast %154 : vector<8x128xf32> to vector<1x8x128xf32>
    tpu.vector_store %arg13[%c3_63, %c0_64, %c0_65], %157 {strides = array<i32>} : memref<8x8x128xf32, #tpu.memory_space<vmem>>, vector<1x8x128xf32>,
    %c4 = arith.constant 4 : index
    %c0_66 = arith.constant 0 : index
    %c0_67 = arith.constant 0 : index
    %158 = vector.load %arg12[%c4, %c0_66, %c0_67] : memref<8x8x384xf32, #tpu.memory_space<vmem>>, vector<1x8x384xf32>
    %159 = vector.shape_cast %158 : vector<1x8x384xf32> to vector<8x384xf32>
    %c0_68 = arith.constant 0 : index
    %c0_69 = arith.constant 0 : index
    %160 = vector.load %arg4[%c0_68, %c0_69] : memref<128x384xf32, #tpu.memory_space<vmem>>, vector<128x384xf32>
    %cst_70 = arith.constant dense<0.000000e+00> : vector<8x384xf32>
    %161 = tpu.matmul %154, %160, %cst_70 {dimension_numbers = #tpu.dot_dimension_numbers<[1], [0], [0], [1], [0, 0, 1, 1], [], []>} : vector<8x128xf32>, vector<128x384xf32>, vector<8x384xf32> -> vector<8x384xf32>
    %c0_71 = arith.constant 0 : index
    %c0_72 = arith.constant 0 : index
    %162 = vector.load %arg6[%c0_71, %c0_72] : memref<1x384xf32, #tpu.memory_space<vmem>>, vector<1x384xf32>
    %163 = vector.broadcast %162 : vector<1x384xf32> to vector<8x384xf32>
    %164 = arith.addf %161, %163 : vector<8x384xf32>
    %165 = vector.extract_strided_slice %159 {offsets = [0, 0], sizes = [8, 128], strides = [1, 1]} : vector<8x384xf32> to vector<8x128xf32>
    %166 = vector.extract_strided_slice %164 {offsets = [0, 0], sizes = [8, 128], strides = [1, 1]} : vector<8x384xf32> to vector<8x128xf32>
    %167 = arith.addf %165, %166 : vector<8x128xf32>
    %168 = arith.negf %167 : vector<8x128xf32>
    %169 = math.exp %168 : vector<8x128xf32>
    %cst_73 = arith.constant 1.000000e+00 : f32
    %170 = vector.broadcast %cst_73 : f32 to vector<8x128xf32>
    %171 = arith.addf %170, %169 : vector<8x128xf32>
    %172 = arith.divf %170, %171 : vector<8x128xf32>
    %173 = vector.extract_strided_slice %159 {offsets = [0, 128], sizes = [8, 128], strides = [1, 1]} : vector<8x384xf32> to vector<8x128xf32>
    %174 = vector.extract_strided_slice %164 {offsets = [0, 128], sizes = [8, 128], strides = [1, 1]} : vector<8x384xf32> to vector<8x128xf32>
    %175 = arith.addf %173, %174 : vector<8x128xf32>
    %176 = arith.negf %175 : vector<8x128xf32>
    %177 = math.exp %176 : vector<8x128xf32>
    %cst_74 = arith.constant 1.000000e+00 : f32
    %178 = vector.broadcast %cst_74 : f32 to vector<8x128xf32>
    %179 = arith.addf %178, %177 : vector<8x128xf32>
    %180 = arith.divf %178, %179 : vector<8x128xf32>
    %181 = vector.extract_strided_slice %159 {offsets = [0, 256], sizes = [8, 128], strides = [1, 1]} : vector<8x384xf32> to vector<8x128xf32>
    %182 = vector.extract_strided_slice %164 {offsets = [0, 256], sizes = [8, 128], strides = [1, 1]} : vector<8x384xf32> to vector<8x128xf32>
    %183 = arith.mulf %172, %182 : vector<8x128xf32>
    %184 = arith.addf %181, %183 : vector<8x128xf32>
    %185 = math.tanh %184 : vector<8x128xf32>
    %cst_75 = arith.constant 1.000000e+00 : f32
    %186 = vector.broadcast %cst_75 : f32 to vector<8x128xf32>
    %187 = arith.subf %186, %180 : vector<8x128xf32>
    %188 = arith.mulf %187, %185 : vector<8x128xf32>
    %189 = arith.mulf %180, %154 : vector<8x128xf32>
    %190 = arith.addf %188, %189 : vector<8x128xf32>
    %c4_76 = arith.constant 4 : index
    %c0_77 = arith.constant 0 : index
    %c0_78 = arith.constant 0 : index
    %191 = vector.load %arg13[%c4_76, %c0_77, %c0_78] : memref<8x8x128xf32, #tpu.memory_space<vmem>>, vector<1x8x128xf32>
    %192 = vector.shape_cast %191 : vector<1x8x128xf32> to vector<8x128xf32>
    %193 = vector.shape_cast %190 : vector<8x128xf32> to vector<1x8x128xf32>
    tpu.vector_store %arg13[%c4_76, %c0_77, %c0_78], %193 {strides = array<i32>} : memref<8x8x128xf32, #tpu.memory_space<vmem>>, vector<1x8x128xf32>,
    %c5 = arith.constant 5 : index
    %c0_79 = arith.constant 0 : index
    %c0_80 = arith.constant 0 : index
    %194 = vector.load %arg12[%c5, %c0_79, %c0_80] : memref<8x8x384xf32, #tpu.memory_space<vmem>>, vector<1x8x384xf32>
    %195 = vector.shape_cast %194 : vector<1x8x384xf32> to vector<8x384xf32>
    %c0_81 = arith.constant 0 : index
    %c0_82 = arith.constant 0 : index
    %196 = vector.load %arg4[%c0_81, %c0_82] : memref<128x384xf32, #tpu.memory_space<vmem>>, vector<128x384xf32>
    %cst_83 = arith.constant dense<0.000000e+00> : vector<8x384xf32>
    %197 = tpu.matmul %190, %196, %cst_83 {dimension_numbers = #tpu.dot_dimension_numbers<[1], [0], [0], [1], [0, 0, 1, 1], [], []>} : vector<8x128xf32>, vector<128x384xf32>, vector<8x384xf32> -> vector<8x384xf32>
    %c0_84 = arith.constant 0 : index
    %c0_85 = arith.constant 0 : index
    %198 = vector.load %arg6[%c0_84, %c0_85] : memref<1x384xf32, #tpu.memory_space<vmem>>, vector<1x384xf32>
    %199 = vector.broadcast %198 : vector<1x384xf32> to vector<8x384xf32>
    %200 = arith.addf %197, %199 : vector<8x384xf32>
    %201 = vector.extract_strided_slice %195 {offsets = [0, 0], sizes = [8, 128], strides = [1, 1]} : vector<8x384xf32> to vector<8x128xf32>
    %202 = vector.extract_strided_slice %200 {offsets = [0, 0], sizes = [8, 128], strides = [1, 1]} : vector<8x384xf32> to vector<8x128xf32>
    %203 = arith.addf %201, %202 : vector<8x128xf32>
    %204 = arith.negf %203 : vector<8x128xf32>
    %205 = math.exp %204 : vector<8x128xf32>
    %cst_86 = arith.constant 1.000000e+00 : f32
    %206 = vector.broadcast %cst_86 : f32 to vector<8x128xf32>
    %207 = arith.addf %206, %205 : vector<8x128xf32>
    %208 = arith.divf %206, %207 : vector<8x128xf32>
    %209 = vector.extract_strided_slice %195 {offsets = [0, 128], sizes = [8, 128], strides = [1, 1]} : vector<8x384xf32> to vector<8x128xf32>
    %210 = vector.extract_strided_slice %200 {offsets = [0, 128], sizes = [8, 128], strides = [1, 1]} : vector<8x384xf32> to vector<8x128xf32>
    %211 = arith.addf %209, %210 : vector<8x128xf32>
    %212 = arith.negf %211 : vector<8x128xf32>
    %213 = math.exp %212 : vector<8x128xf32>
    %cst_87 = arith.constant 1.000000e+00 : f32
    %214 = vector.broadcast %cst_87 : f32 to vector<8x128xf32>
    %215 = arith.addf %214, %213 : vector<8x128xf32>
    %216 = arith.divf %214, %215 : vector<8x128xf32>
    %217 = vector.extract_strided_slice %195 {offsets = [0, 256], sizes = [8, 128], strides = [1, 1]} : vector<8x384xf32> to vector<8x128xf32>
    %218 = vector.extract_strided_slice %200 {offsets = [0, 256], sizes = [8, 128], strides = [1, 1]} : vector<8x384xf32> to vector<8x128xf32>
    %219 = arith.mulf %208, %218 : vector<8x128xf32>
    %220 = arith.addf %217, %219 : vector<8x128xf32>
    %221 = math.tanh %220 : vector<8x128xf32>
    %cst_88 = arith.constant 1.000000e+00 : f32
    %222 = vector.broadcast %cst_88 : f32 to vector<8x128xf32>
    %223 = arith.subf %222, %216 : vector<8x128xf32>
    %224 = arith.mulf %223, %221 : vector<8x128xf32>
    %225 = arith.mulf %216, %190 : vector<8x128xf32>
    %226 = arith.addf %224, %225 : vector<8x128xf32>
    %c5_89 = arith.constant 5 : index
    %c0_90 = arith.constant 0 : index
    %c0_91 = arith.constant 0 : index
    %227 = vector.load %arg13[%c5_89, %c0_90, %c0_91] : memref<8x8x128xf32, #tpu.memory_space<vmem>>, vector<1x8x128xf32>
    %228 = vector.shape_cast %227 : vector<1x8x128xf32> to vector<8x128xf32>
    %229 = vector.shape_cast %226 : vector<8x128xf32> to vector<1x8x128xf32>
    tpu.vector_store %arg13[%c5_89, %c0_90, %c0_91], %229 {strides = array<i32>} : memref<8x8x128xf32, #tpu.memory_space<vmem>>, vector<1x8x128xf32>,
    %c6 = arith.constant 6 : index
    %c0_92 = arith.constant 0 : index
    %c0_93 = arith.constant 0 : index
    %230 = vector.load %arg12[%c6, %c0_92, %c0_93] : memref<8x8x384xf32, #tpu.memory_space<vmem>>, vector<1x8x384xf32>
    %231 = vector.shape_cast %230 : vector<1x8x384xf32> to vector<8x384xf32>
    %c0_94 = arith.constant 0 : index
    %c0_95 = arith.constant 0 : index
    %232 = vector.load %arg4[%c0_94, %c0_95] : memref<128x384xf32, #tpu.memory_space<vmem>>, vector<128x384xf32>
    %cst_96 = arith.constant dense<0.000000e+00> : vector<8x384xf32>
    %233 = tpu.matmul %226, %232, %cst_96 {dimension_numbers = #tpu.dot_dimension_numbers<[1], [0], [0], [1], [0, 0, 1, 1], [], []>} : vector<8x128xf32>, vector<128x384xf32>, vector<8x384xf32> -> vector<8x384xf32>
    %c0_97 = arith.constant 0 : index
    %c0_98 = arith.constant 0 : index
    %234 = vector.load %arg6[%c0_97, %c0_98] : memref<1x384xf32, #tpu.memory_space<vmem>>, vector<1x384xf32>
    %235 = vector.broadcast %234 : vector<1x384xf32> to vector<8x384xf32>
    %236 = arith.addf %233, %235 : vector<8x384xf32>
    %237 = vector.extract_strided_slice %231 {offsets = [0, 0], sizes = [8, 128], strides = [1, 1]} : vector<8x384xf32> to vector<8x128xf32>
    %238 = vector.extract_strided_slice %236 {offsets = [0, 0], sizes = [8, 128], strides = [1, 1]} : vector<8x384xf32> to vector<8x128xf32>
    %239 = arith.addf %237, %238 : vector<8x128xf32>
    %240 = arith.negf %239 : vector<8x128xf32>
    %241 = math.exp %240 : vector<8x128xf32>
    %cst_99 = arith.constant 1.000000e+00 : f32
    %242 = vector.broadcast %cst_99 : f32 to vector<8x128xf32>
    %243 = arith.addf %242, %241 : vector<8x128xf32>
    %244 = arith.divf %242, %243 : vector<8x128xf32>
    %245 = vector.extract_strided_slice %231 {offsets = [0, 128], sizes = [8, 128], strides = [1, 1]} : vector<8x384xf32> to vector<8x128xf32>
    %246 = vector.extract_strided_slice %236 {offsets = [0, 128], sizes = [8, 128], strides = [1, 1]} : vector<8x384xf32> to vector<8x128xf32>
    %247 = arith.addf %245, %246 : vector<8x128xf32>
    %248 = arith.negf %247 : vector<8x128xf32>
    %249 = math.exp %248 : vector<8x128xf32>
    %cst_100 = arith.constant 1.000000e+00 : f32
    %250 = vector.broadcast %cst_100 : f32 to vector<8x128xf32>
    %251 = arith.addf %250, %249 : vector<8x128xf32>
    %252 = arith.divf %250, %251 : vector<8x128xf32>
    %253 = vector.extract_strided_slice %231 {offsets = [0, 256], sizes = [8, 128], strides = [1, 1]} : vector<8x384xf32> to vector<8x128xf32>
    %254 = vector.extract_strided_slice %236 {offsets = [0, 256], sizes = [8, 128], strides = [1, 1]} : vector<8x384xf32> to vector<8x128xf32>
    %255 = arith.mulf %244, %254 : vector<8x128xf32>
    %256 = arith.addf %253, %255 : vector<8x128xf32>
    %257 = math.tanh %256 : vector<8x128xf32>
    %cst_101 = arith.constant 1.000000e+00 : f32
    %258 = vector.broadcast %cst_101 : f32 to vector<8x128xf32>
    %259 = arith.subf %258, %252 : vector<8x128xf32>
    %260 = arith.mulf %259, %257 : vector<8x128xf32>
    %261 = arith.mulf %252, %226 : vector<8x128xf32>
    %262 = arith.addf %260, %261 : vector<8x128xf32>
    %c6_102 = arith.constant 6 : index
    %c0_103 = arith.constant 0 : index
    %c0_104 = arith.constant 0 : index
    %263 = vector.load %arg13[%c6_102, %c0_103, %c0_104] : memref<8x8x128xf32, #tpu.memory_space<vmem>>, vector<1x8x128xf32>
    %264 = vector.shape_cast %263 : vector<1x8x128xf32> to vector<8x128xf32>
    %265 = vector.shape_cast %262 : vector<8x128xf32> to vector<1x8x128xf32>
    tpu.vector_store %arg13[%c6_102, %c0_103, %c0_104], %265 {strides = array<i32>} : memref<8x8x128xf32, #tpu.memory_space<vmem>>, vector<1x8x128xf32>,
    %c7 = arith.constant 7 : index
    %c0_105 = arith.constant 0 : index
    %c0_106 = arith.constant 0 : index
    %266 = vector.load %arg12[%c7, %c0_105, %c0_106] : memref<8x8x384xf32, #tpu.memory_space<vmem>>, vector<1x8x384xf32>
    %267 = vector.shape_cast %266 : vector<1x8x384xf32> to vector<8x384xf32>
    %c0_107 = arith.constant 0 : index
    %c0_108 = arith.constant 0 : index
    %268 = vector.load %arg4[%c0_107, %c0_108] : memref<128x384xf32, #tpu.memory_space<vmem>>, vector<128x384xf32>
    %cst_109 = arith.constant dense<0.000000e+00> : vector<8x384xf32>
    %269 = tpu.matmul %262, %268, %cst_109 {dimension_numbers = #tpu.dot_dimension_numbers<[1], [0], [0], [1], [0, 0, 1, 1], [], []>} : vector<8x128xf32>, vector<128x384xf32>, vector<8x384xf32> -> vector<8x384xf32>
    %c0_110 = arith.constant 0 : index
    %c0_111 = arith.constant 0 : index
    %270 = vector.load %arg6[%c0_110, %c0_111] : memref<1x384xf32, #tpu.memory_space<vmem>>, vector<1x384xf32>
    %271 = vector.broadcast %270 : vector<1x384xf32> to vector<8x384xf32>
    %272 = arith.addf %269, %271 : vector<8x384xf32>
    %273 = vector.extract_strided_slice %267 {offsets = [0, 0], sizes = [8, 128], strides = [1, 1]} : vector<8x384xf32> to vector<8x128xf32>
    %274 = vector.extract_strided_slice %272 {offsets = [0, 0], sizes = [8, 128], strides = [1, 1]} : vector<8x384xf32> to vector<8x128xf32>
    %275 = arith.addf %273, %274 : vector<8x128xf32>
    %276 = arith.negf %275 : vector<8x128xf32>
    %277 = math.exp %276 : vector<8x128xf32>
    %cst_112 = arith.constant 1.000000e+00 : f32
    %278 = vector.broadcast %cst_112 : f32 to vector<8x128xf32>
    %279 = arith.addf %278, %277 : vector<8x128xf32>
    %280 = arith.divf %278, %279 : vector<8x128xf32>
    %281 = vector.extract_strided_slice %267 {offsets = [0, 128], sizes = [8, 128], strides = [1, 1]} : vector<8x384xf32> to vector<8x128xf32>
    %282 = vector.extract_strided_slice %272 {offsets = [0, 128], sizes = [8, 128], strides = [1, 1]} : vector<8x384xf32> to vector<8x128xf32>
    %283 = arith.addf %281, %282 : vector<8x128xf32>
    %284 = arith.negf %283 : vector<8x128xf32>
    %285 = math.exp %284 : vector<8x128xf32>
    %cst_113 = arith.constant 1.000000e+00 : f32
    %286 = vector.broadcast %cst_113 : f32 to vector<8x128xf32>
    %287 = arith.addf %286, %285 : vector<8x128xf32>
    %288 = arith.divf %286, %287 : vector<8x128xf32>
    %289 = vector.extract_strided_slice %267 {offsets = [0, 256], sizes = [8, 128], strides = [1, 1]} : vector<8x384xf32> to vector<8x128xf32>
    %290 = vector.extract_strided_slice %272 {offsets = [0, 256], sizes = [8, 128], strides = [1, 1]} : vector<8x384xf32> to vector<8x128xf32>
    %291 = arith.mulf %280, %290 : vector<8x128xf32>
    %292 = arith.addf %289, %291 : vector<8x128xf32>
    %293 = math.tanh %292 : vector<8x128xf32>
    %cst_114 = arith.constant 1.000000e+00 : f32
    %294 = vector.broadcast %cst_114 : f32 to vector<8x128xf32>
    %295 = arith.subf %294, %288 : vector<8x128xf32>
    %296 = arith.mulf %295, %293 : vector<8x128xf32>
    %297 = arith.mulf %288, %262 : vector<8x128xf32>
    %298 = arith.addf %296, %297 : vector<8x128xf32>
    %c7_115 = arith.constant 7 : index
    %c0_116 = arith.constant 0 : index
    %c0_117 = arith.constant 0 : index
    %299 = vector.load %arg13[%c7_115, %c0_116, %c0_117] : memref<8x8x128xf32, #tpu.memory_space<vmem>>, vector<1x8x128xf32>
    %300 = vector.shape_cast %299 : vector<1x8x128xf32> to vector<8x128xf32>
    %301 = vector.shape_cast %298 : vector<8x128xf32> to vector<1x8x128xf32>
    tpu.vector_store %arg13[%c7_115, %c0_116, %c0_117], %301 {strides = array<i32>} : memref<8x8x128xf32, #tpu.memory_space<vmem>>, vector<1x8x128xf32>,
    %c0_118 = arith.constant 0 : index
    %c0_119 = arith.constant 0 : index
    %302 = vector.load %arg11[%c0_118, %c0_119] : memref<8x128xf32, #tpu.memory_space<vmem>>, vector<8x128xf32>
    tpu.vector_store %arg11[%c0_118, %c0_119], %298 {strides = array<i32>} : memref<8x128xf32, #tpu.memory_space<vmem>>, vector<8x128xf32>,
    %c0_120 = arith.constant 0 : index
    %c0_121 = arith.constant 0 : index
    %c0_122 = arith.constant 0 : index
    %303 = vector.load %arg13[%c0_120, %c0_121, %c0_122] : memref<8x8x128xf32, #tpu.memory_space<vmem>>, vector<8x8x128xf32>
    %304 = vector.shape_cast %303 : vector<8x8x128xf32> to vector<64x128xf32>
    %c0_123 = arith.constant 0 : index
    %c0_124 = arith.constant 0 : index
    %305 = vector.load %arg7[%c0_123, %c0_124] : memref<128x128xf32, #tpu.memory_space<vmem>>, vector<128x128xf32>
    %cst_125 = arith.constant dense<0.000000e+00> : vector<64x128xf32>
    %306 = tpu.matmul %304, %305, %cst_125 {dimension_numbers = #tpu.dot_dimension_numbers<[1], [0], [0], [1], [0, 0, 1, 1], [], []>} : vector<64x128xf32>, vector<128x128xf32>, vector<64x128xf32> -> vector<64x128xf32>
    %c0_126 = arith.constant 0 : index
    %c0_127 = arith.constant 0 : index
    %307 = vector.load %arg8[%c0_126, %c0_127] : memref<128x128xf32, #tpu.memory_space<vmem>>, vector<128x128xf32>
    %cst_128 = arith.constant dense<0.000000e+00> : vector<8x128xf32>
    %308 = tpu.matmul %0, %307, %cst_128 {dimension_numbers = #tpu.dot_dimension_numbers<[1], [0], [0], [1], [0, 0, 1, 1], [], []>} : vector<8x128xf32>, vector<128x128xf32>, vector<8x128xf32> -> vector<8x128xf32>
    %c0_129 = arith.constant 0 : index
    %c0_130 = arith.constant 0 : index
    %309 = vector.load %arg9[%c0_129, %c0_130] : memref<1x128xf32, #tpu.memory_space<vmem>>, vector<1x128xf32>
    %310 = vector.broadcast %309 : vector<1x128xf32> to vector<8x128xf32>
    %311 = arith.addf %308, %310 : vector<8x128xf32>
    %312 = vector.shape_cast %306 : vector<64x128xf32> to vector<8x8x128xf32>
    %313 = vector.shape_cast %311 : vector<8x128xf32> to vector<1x8x128xf32>
    %314 = vector.broadcast %313 : vector<1x8x128xf32> to vector<8x8x128xf32>
    %315 = arith.addf %312, %314 : vector<8x8x128xf32>
    %c0_131 = arith.constant 0 : index
    %c0_132 = arith.constant 0 : index
    %c0_133 = arith.constant 0 : index
    %316 = vector.load %arg10[%c0_131, %c0_132, %c0_133] : memref<8x8x128xf32, #tpu.memory_space<vmem>>, vector<8x8x128xf32>
    tpu.vector_store %arg10[%c0_131, %c0_132, %c0_133], %315 {strides = array<i32>} : memref<8x8x128xf32, #tpu.memory_space<vmem>>, vector<8x8x128xf32>,
    return
  }
}

</mosaic_0001>

<bundles_post_ra>
// kernel: decoder_forward.1
= control target key start
LH: loop header
LB: loop body
LE: loop exit
PB: predicated region body
PF: predicated region fallthrough
CT: control target
= control target key end

     0   :  { %v5087_v3 = vmov 0.0   ;;  %vm58_vm0 = vcmask 261120   ;;  %vm3401_vm1 = vmmov 0   ;;  %s5071_s2 = inlined_call_operand.vmem [shape: f32[32,384], index: 2, kind: input, shape index: {}]   ;;  %s5072_s0 = inlined_call_operand.vmem [shape: f32[64,32], index: 0, kind: input, shape index: {}]   ;;  %s5073_s3 = inlined_call_operand.vmem [shape: f32[128,384], index: 3, kind: input, shape index: {}]   ;;  %s5074_s1 = inlined_call_operand.vmem [shape: f32[8,128], index: 1, kind: input, shape index: {}]   ;;  %s5075_s4 = inlined_call_operand.vmem [shape: f32[128,384], index: 4, kind: input, shape index: {}]   ;;  %s5076_s5 = inlined_call_operand.vmem [shape: f32[1,384], index: 5, kind: input, shape index: {}]   ;;  %s5077_s6 = inlined_call_operand.vmem [shape: f32[1,384], index: 6, kind: input, shape index: {}]   ;;  %s5078_s7 = inlined_call_operand.vmem [shape: f32[128,128], index: 7, kind: input, shape index: {}]   ;;  %s5079_s8 = inlined_call_operand.vmem [shape: f32[128,128], index: 8, kind: input, shape index: {}]   ;;  %s5080_s9 = inlined_call_operand.vmem [shape: f32[1,128], index: 9, kind: input, shape index: {}]   ;;  %s5081_s10 = inlined_call_operand.vmem [shape: f32[8,8,128], index: 10, kind: output, shape index: {0}]   ;;  %s5082_s11 = inlined_call_operand.vmem [shape: f32[8,128], index: 11, kind: output, shape index: {1}]  }
   0x1   :  { %v56_v0 = vld [vmem:[%s5071_s2 + $0x50] sm:$0xff]  ;;  %v55_v1 = vld [vmem:[%s5071_s2 + $0x48] sm:$0xff]  ;;  %v57_v2 = vld [vmem:[%s5071_s2 + $0x58] sm:$0xff]  ;;  %147 = vmatprep.mubr.f32.mxu0 %v5087_v3 }
   0x2   :  { %107 = vmatprep.subr.mxu0 %v56_v0  ;;  %2903 = vmatprep.subr.mxu1 %v57_v2  ;;  %v53_v4 = vld [vmem:[%s5071_s2 + $0x38] sm:$0xff]  ;;  %v52_v5 = vld [vmem:[%s5071_s2 + $0x30] sm:$0xff]  ;;  %v54_v6 = vld [vmem:[%s5071_s2 + $0x40] sm:$0xff] }
   0x3   :  { %108 = vmatpush1.msra.mxu0 %v55_v1  ;;  %2904 = vmatpush3.msra.mxu1 %v57_v2  ;;  %v50_v7 = vld [vmem:[%s5071_s2 + $0x20] sm:$0xff]  ;;  %v51_v8 = vld [vmem:[%s5071_s2 + $0x28] sm:$0xff]  ;;  %v49_v9 = vld [vmem:[%s5071_s2 + $0x18] sm:$0xff] }
   0x4   :  { %109 = vmatprep.subr.mxu0 %v53_v4  ;;  %2905 = vmatprep.subr.mxu1 %v54_v6  ;;  %v47_v10 = vld [vmem:[%s5071_s2 + $0x8] sm:$0xff]  ;;  %v48_v11 = vld [vmem:[%s5071_s2 + $0x10] sm:$0xff]  ;;  %v46_v12 = vld [vmem:[%s5071_s2] sm:$0xff] }
   0x5   :  { %110 = vmatpush1.msra.mxu0 %v52_v5  ;;  %2906 = vmatpush3.msra.mxu1 %v54_v6  ;;  %v38_v13 = vld [vmem:[%s5072_s0] sm:$0xff]  ;;  %v347_v14 = vld [vmem:[%s5073_s3 + $0x170] sm:$0xff]  ;;  %v346_v15 = vld [vmem:[%s5073_s3 + $0x168] sm:$0xff] }
   0x6   :  { %111 = vmatprep.subr.mxu0 %v50_v7  ;;  %2907 = vmatprep.subr.mxu1 %v51_v8  ;;  %v39_v16 = vld [vmem:[%s5072_s0 + $0x8] sm:$0xff]  ;;  %v344_v17 = vld [vmem:[%s5073_s3 + $0x158] sm:$0xff]  ;;  %v343_v19 = vld [vmem:[%s5073_s3 + $0x150] sm:$0xff] }
   0x7   :  { %112 = vmatpush1.msra.mxu0 %v49_v9  ;;  %2908 = vmatpush3.msra.mxu1 %v51_v8  ;;  %v348_v18 = vld [vmem:[%s5073_s3 + $0x178] sm:$0xff]  ;;  %v341_v20 = vld [vmem:[%s5073_s3 + $0x140] sm:$0xff]  ;;  %v338_v23 = vld [vmem:[%s5073_s3 + $0x128] sm:$0xff] }
   0x8   :  { %113 = vmatprep.subr.mxu0 %v47_v10  ;;  %2909 = vmatprep.subr.mxu1 %v48_v11  ;;  %v345_v21 = vld [vmem:[%s5073_s3 + $0x160] sm:$0xff]  ;;  %v340_v22 = vld [vmem:[%s5073_s3 + $0x138] sm:$0xff]  ;;  %v342_v24 = vld [vmem:[%s5073_s3 + $0x148] sm:$0xff] }
   0x9   :  { %114 = vmatpush1.msra.mxu0 %v46_v12  ;;  %2910 = vmatpush3.msra.mxu1 %v48_v11  ;;  %v337_v25 = vld [vmem:[%s5073_s3 + $0x120] sm:$0xff]  ;;  %v40_v26 = vld [vmem:[%s5072_s0 + $0x10] sm:$0xff]  ;;  %v334_v29 = vld [vmem:[%s5073_s3 + $0x108] sm:$0xff] }
   0xa   :  { %2664 = vmatmul.mubr.msk.f32.vlgmr.msra.gmra.mxu0 %vm58_vm0, %v38_v13  ;;  %366 = vmatprep.subr.mxu0 %v347_v14  ;;  %v335_v27 = vld [vmem:[%s5073_s3 + $0x110] sm:$0xff]  ;;  %v332_v30 = vld [vmem:[%s5073_s3 + $0xf8] sm:$0xff]  ;;  %v329_v34 = vld [vmem:[%s5073_s3 + $0xe0] sm:$0xff] }
   0xb   :  { %2911 = vmatprep.mubr.msk.f32.mxu1 %vm58_vm0, %v38_v13  ;;  %367 = vmatpush1.msra.mxu0 %v346_v15  ;;  %v339_v28 = vld [vmem:[%s5073_s3 + $0x130] sm:$0xff]  ;;  %v336_v31 = vld [vmem:[%s5073_s3 + $0x118] sm:$0xff]  ;;  %v333_v35 = vld [vmem:[%s5073_s3 + $0x100] sm:$0xff] }
   0xc   :  { %2923 = vmatprep.subr.mxu1 %v5087_v3  ;;  %2912 = vmatmul.mubr.msk.f32.vlgmr.msra.gmra.mxu1 %vm58_vm0, %v39_v16  ;;  %v331_v32 = vld [vmem:[%s5073_s3 + $0xf0] sm:$0xff]  ;;  %v41_v33 = vld [vmem:[%s5072_s0 + $0x18] sm:$0xff]  ;;  %v326_v37 = vld [vmem:[%s5073_s3 + $0xc8] sm:$0xff] }
   0xd   :  { %368 = vmatprep.subr.mxu0 %v344_v17  ;;  %2924 = vmatpush3.msra.mxu1 %v348_v18  ;;  %v328_v36 = vld [vmem:[%s5073_s3 + $0xd8] sm:$0xff]  ;;  %v330_v38 = vld [vmem:[%s5073_s3 + $0xe8] sm:$0xff]  ;;  %v325_v39 = vld [vmem:[%s5073_s3 + $0xc0] sm:$0xff] }
   0xe   :  { %153 = vmatprep.mubr.f32.mxu0 %v5087_v3  ;;  %369 = vmatpush1.msra.mxu0 %v343_v19  ;;  %v42_v40 = vld [vmem:[%s5072_s0 + $0x20] sm:$0xff]  ;;  %v323_v41 = vld [vmem:[%s5073_s3 + $0xb0] sm:$0xff]  ;;  %v322_v43 = vld [vmem:[%s5073_s3 + $0xa8] sm:$0xff] }
   0xf   :  { %2925 = vmatprep.subr.mxu1 %v5087_v3  ;;  %2665 = vmatmul.mubr.msk.f32.gmra.mxu0 %vm58_vm0, %v39_v16  ;;  %v327_v42 = vld [vmem:[%s5073_s3 + $0xd0] sm:$0xff]  ;;  %v320_v44 = vld [vmem:[%s5073_s3 + $0x98] sm:$0xff]  ;;  %v43_v47 = vld [vmem:[%s5072_s0 + $0x28] sm:$0xff] }
  0x10   :  { %370 = vmatprep.subr.mxu0 %v341_v20  ;;  %2926 = vmatpush3.msra.mxu1 %v345_v21  ;;  %v324_v45 = vld [vmem:[%s5073_s3 + $0xb8] sm:$0xff]  ;;  %v319_v46 = vld [vmem:[%s5073_s3 + $0x90] sm:$0xff]  ;;  %v317_v48 = vld [vmem:[%s5073_s3 + $0x80] sm:$0xff] }
  0x11   :  { %371 = vmatpush1.msra.mxu0 %v340_v22  ;;  %2927 = vmatprep.subr.mxu1 %v5087_v3  ;;  %v321_v49 = vld [vmem:[%s5073_s3 + $0xa0] sm:$0xff]  ;;  %v316_v50 = vld [vmem:[%s5073_s3 + $0x78] sm:$0xff]  ;;  %v314_v51 = vld [vmem:[%s5073_s3 + $0x68] sm:$0xff] }
  0x12   :  { %372 = vmatprep.subr.mxu0 %v338_v23  ;;  %2928 = vmatpush3.msra.mxu1 %v342_v24  ;;  %v318_v52 = vld [vmem:[%s5073_s3 + $0x88] sm:$0xff]  ;;  %v313_v53 = vld [vmem:[%s5073_s3 + $0x60] sm:$0xff]  ;;  %v44_v54 = vld [vmem:[%s5072_s0 + $0x30] sm:$0xff] }
  0x13   :  { %159 = vmatprep.mubr.f32.mxu0 %v5087_v3  ;;  %373 = vmatpush1.msra.mxu0 %v337_v25  ;;  %v311_v55 = vld [vmem:[%s5073_s3 + $0x50] sm:$0xff]  ;;  %v310_v57 = vld [vmem:[%s5073_s3 + $0x48] sm:$0xff]  ;;  %v308_v58 = vld [vmem:[%s5073_s3 + $0x38] sm:$0xff] }
  0x14   :  { %2929 = vmatprep.subr.mxu1 %v5087_v3  ;;  %2666 = vmatmul.mubr.msk.f32.gmra.mxu0 %vm58_vm0, %v40_v26  ;;  %v315_v56 = vld [vmem:[%s5073_s3 + $0x70] sm:$0xff]  ;;  %v312_v59 = vld [vmem:[%s5073_s3 + $0x58] sm:$0xff]  ;;  %v305_v62 = vld [vmem:[%s5073_s3 + $0x20] sm:$0xff] }
  0x15   :  { %374 = vmatprep.subr.mxu0 %v335_v27  ;;  %2930 = vmatpush3.msra.mxu1 %v339_v28  ;;  %v307_v60 = vld [vmem:[%s5073_s3 + $0x30] sm:$0xff]  ;;  %v45_v61 = vld [vmem:[%s5072_s0 + $0x38] sm:$0xff]  ;;  %v309_v63 = vld [vmem:[%s5073_s3 + $0x40] sm:$0xff] }
  0x16   :  { %375 = vmatpush1.msra.mxu0 %v334_v29  ;;  %2931 = vmatprep.subr.mxu1 %v5087_v3  ;;  %v304_v0 = vld [vmem:[%s5073_s3 + $0x18] sm:$0xff]  ;;  %v302_v1 = vld [vmem:[%s5073_s3 + $0x8] sm:$0xff]  ;;  %v301_v4 = vld [vmem:[%s5073_s3] sm:$0xff] }
  0x17   :  { %376 = vmatprep.subr.mxu0 %v332_v30  ;;  %2932 = vmatpush3.msra.mxu1 %v336_v31  ;;  %v306_v2 = vld [vmem:[%s5073_s3 + $0x28] sm:$0xff]  ;;  %v3705_v5 = vld [vmem:[%s5074_s1] sm:$0xff]  ;;  %v303_v6 = vld [vmem:[%s5073_s3 + $0x10] sm:$0xff] }
  0x18   :  { %165 = vmatprep.mubr.f32.mxu0 %v5087_v3  ;;  %377 = vmatpush1.msra.mxu0 %v331_v32  ;;  %v3714_v7 = vld [vmem:[%s5075_s4 + $0x170] sm:$0xff]  ;;  %v3721_v8 = vld [vmem:[%s5075_s4 + $0x168] sm:$0xff]  ;;  %v3728_v9 = vld [vmem:[%s5075_s4 + $0x158] sm:$0xff] }
  0x19   :  { %2933 = vmatprep.subr.mxu1 %v5087_v3  ;;  %2667 = vmatmul.mubr.msk.f32.gmra.mxu0 %vm58_vm0, %v41_v33  ;;  %5160 = vst [vmem:[#allocation4_spill] sm:$0xff] %v3714_v7  ;;  %v3735_v10 = vld [vmem:[%s5075_s4 + $0x150] sm:$0xff]  ;;  %v3740_v11 = vld [vmem:[%s5075_s4 + $0x178] sm:$0xff]  ;;  %v3746_v12 = vld [vmem:[%s5075_s4 + $0x140] sm:$0xff] }
  0x1a   :  { %378 = vmatprep.subr.mxu0 %v329_v34  ;;  %2934 = vmatpush3.msra.mxu1 %v333_v35  ;;  %v3753_v13 = vld [vmem:[%s5075_s4 + $0x138] sm:$0xff]  ;;  %v3759_v14 = vld [vmem:[%s5075_s4 + $0x160] sm:$0xff]  ;;  %v3765_v15 = vld [vmem:[%s5075_s4 + $0x128] sm:$0xff] }
  0x1b   :  { %379 = vmatpush1.msra.mxu0 %v328_v36  ;;  %2935 = vmatprep.subr.mxu1 %v5087_v3  ;;  %v3772_v16 = vld [vmem:[%s5075_s4 + $0x120] sm:$0xff]  ;;  %v3778_v17 = vld [vmem:[%s5075_s4 + $0x148] sm:$0xff]  ;;  %v3784_v18 = vld [vmem:[%s5075_s4 + $0x110] sm:$0xff] }
  0x1c   :  { %380 = vmatprep.subr.mxu0 %v326_v37  ;;  %2936 = vmatpush3.msra.mxu1 %v330_v38  ;;  %v3791_v19 = vld [vmem:[%s5075_s4 + $0x108] sm:$0xff]  ;;  %v3797_v20 = vld [vmem:[%s5075_s4 + $0x130] sm:$0xff]  ;;  %v3803_v21 = vld [vmem:[%s5075_s4 + $0xf8] sm:$0xff] }
  0x1d   :  { %171 = vmatprep.mubr.f32.mxu0 %v5087_v3  ;;  %381 = vmatpush1.msra.mxu0 %v325_v39  ;;  %v3810_v22 = vld [vmem:[%s5075_s4 + $0xf0] sm:$0xff]  ;;  %v3816_v23 = vld [vmem:[%s5075_s4 + $0x118] sm:$0xff]  ;;  %v3822_v24 = vld [vmem:[%s5075_s4 + $0xe0] sm:$0xff] }
  0x1e   :  { %2937 = vmatprep.subr.mxu1 %v5087_v3  ;;  %2668 = vmatmul.mubr.msk.f32.gmra.mxu0 %vm58_vm0, %v42_v40  ;;  %v3829_v25 = vld [vmem:[%s5075_s4 + $0xd8] sm:$0xff]  ;;  %v3841_v27 = vld [vmem:[%s5075_s4 + $0xc8] sm:$0xff]  ;;  %v3848_v28 = vld [vmem:[%s5075_s4 + $0xc0] sm:$0xff] }
  0x1f   :  { %382 = vmatprep.subr.mxu0 %v323_v41  ;;  %2938 = vmatpush3.msra.mxu1 %v327_v42  ;;  %5161 = vst [vmem:[#allocation5_spill] sm:$0xff] %v3829_v25  ;;  %5162 = vst [vmem:[#allocation6_spill] sm:$0xff] %v3841_v27  ;;  %v3854_v29 = vld [vmem:[%s5075_s4 + $0xe8] sm:$0xff]  ;;  %v3860_v30 = vld [vmem:[%s5075_s4 + $0xb0] sm:$0xff] }
  0x20   :  { %383 = vmatpush1.msra.mxu0 %v322_v43  ;;  %2939 = vmatprep.subr.mxu1 %v5087_v3  ;;  %5163 = vst [vmem:[#allocation7_spill] sm:$0xff] %v3848_v28  ;;  %5164 = vst [vmem:[#allocation8_spill] sm:$0xff] %v3854_v29  ;;  %v3867_v31 = vld [vmem:[%s5075_s4 + $0xa8] sm:$0xff]  ;;  %v3873_v32 = vld [vmem:[%s5075_s4 + $0xd0] sm:$0xff] }
  0x21   :  { %384 = vmatprep.subr.mxu0 %v320_v44  ;;  %2940 = vmatpush3.msra.mxu1 %v324_v45  ;;  %5165 = vst [vmem:[#allocation9_spill] sm:$0xff] %v3860_v30  ;;  %5166 = vst [vmem:[#allocation10_spill] sm:$0xff] %v3867_v31  ;;  %v3886_v34 = vld [vmem:[%s5075_s4 + $0x90] sm:$0xff]  ;;  %v3892_v35 = vld [vmem:[%s5075_s4 + $0xb8] sm:$0xff] }
  0x22   :  { %177 = vmatprep.mubr.f32.mxu0 %v5087_v3  ;;  %385 = vmatpush1.msra.mxu0 %v319_v46  ;;  %5167 = vst [vmem:[#allocation11_spill] sm:$0xff] %v3873_v32  ;;  %5169 = vst [vmem:[#allocation13_spill] sm:$0xff] %v3886_v34  ;;  %v3898_v36 = vld [vmem:[%s5075_s4 + $0x80] sm:$0xff]  ;;  %v3905_v37 = vld [vmem:[%s5075_s4 + $0x78] sm:$0xff] }
  0x23   :  { %2941 = vmatprep.subr.mxu1 %v5087_v3  ;;  %2669 = vmatmul.mubr.msk.f32.gmra.mxu0 %vm58_vm0, %v43_v47  ;;  %5170 = vst [vmem:[#allocation14_spill] sm:$0xff] %v3892_v35  ;;  %5171 = vst [vmem:[#allocation15_spill] sm:$0xff] %v3898_v36  ;;  %v3911_v38 = vld [vmem:[%s5075_s4 + $0xa0] sm:$0xff]  ;;  %v3917_v39 = vld [vmem:[%s5075_s4 + $0x68] sm:$0xff] }
  0x24   :  { %2914 = vmatprep.mubr.msk.f32.mxu1 %vm58_vm0, %v40_v26  ;;  %386 = vmatprep.subr.mxu0 %v317_v48  ;;  %v3835_v26 = vld [vmem:[%s5075_s4 + $0x100] sm:$0xff]  ;;  %5172 = vst [vmem:[#allocation16_spill] sm:$0xff] %v3905_v37  ;;  %5173 = vst [vmem:[#allocation17_spill] sm:$0xff] %v3911_v38  ;;  %v3930_v41 = vld [vmem:[%s5075_s4 + $0x88] sm:$0xff] }
  0x25   :  { %2942 = vmatpush3.msra.mxu1 %v321_v49  ;;  %387 = vmatpush1.msra.mxu0 %v316_v50  ;;  %5174 = vst [vmem:[#allocation18_spill] sm:$0xff] %v3917_v39  ;;  %5176 = vst [vmem:[#allocation20_spill] sm:$0xff] %v3930_v41  ;;  %v3936_v42 = vld [vmem:[%s5075_s4 + $0x50] sm:$0xff]  ;;  %v3943_v43 = vld [vmem:[%s5075_s4 + $0x48] sm:$0xff] }
  0x26   :  { %2915 = vmatmul.mubr.msk.f32.gmra.mxu1 %vm58_vm0, %v41_v33  ;;  %2943 = vmatprep.subr.mxu1 %v5087_v3  ;;  %v3879_v33 = vld [vmem:[%s5075_s4 + $0x98] sm:$0xff]  ;;  %5177 = vst [vmem:[#allocation21_spill] sm:$0xff] %v3936_v42  ;;  %5178 = vst [vmem:[#allocation22_spill] sm:$0xff] %v3943_v43  ;;  %v3949_v44 = vld [vmem:[%s5075_s4 + $0x70] sm:$0xff] }
  0x27   :  { %388 = vmatprep.subr.mxu0 %v314_v51  ;;  %2944 = vmatpush3.msra.mxu1 %v318_v52  ;;  %5168 = vst [vmem:[#allocation12_spill] sm:$0xff] %v3879_v33  ;;  %5179 = vst [vmem:[#allocation23_spill] sm:$0xff] %v3949_v44  ;;  %v3955_v45 = vld [vmem:[%s5075_s4 + $0x38] sm:$0xff]  ;;  %v3962_v46 = vld [vmem:[%s5075_s4 + $0x30] sm:$0xff] }
  0x28   :  { %183 = vmatprep.mubr.f32.mxu0 %v5087_v3  ;;  %389 = vmatpush1.msra.mxu0 %v313_v53  ;;  %5180 = vst [vmem:[#allocation24_spill] sm:$0xff] %v3955_v45  ;;  %5181 = vst [vmem:[#allocation25_spill] sm:$0xff] %v3962_v46  ;;  %v3974_v48 = vld [vmem:[%s5075_s4 + $0x20] sm:$0xff]  ;;  %v3981_v49 = vld [vmem:[%s5075_s4 + $0x18] sm:$0xff] }
  0x29   :  { %2945 = vmatprep.subr.mxu1 %v5087_v3  ;;  %2670 = vmatmul.mubr.msk.f32.gmra.mxu0 %vm58_vm0, %v44_v54  ;;  %5183 = vst [vmem:[#allocation27_spill] sm:$0xff] %v3974_v48  ;;  %5184 = vst [vmem:[#allocation28_spill] sm:$0xff] %v3981_v49  ;;  %v3987_v50 = vld [vmem:[%s5075_s4 + $0x40] sm:$0xff]  ;;  %v3993_v51 = vld [vmem:[%s5075_s4 + $0x8] sm:$0xff] }
  0x2a   :  { %2917 = vmatprep.mubr.msk.f32.mxu1 %vm58_vm0, %v42_v40  ;;  %390 = vmatprep.subr.mxu0 %v311_v55  ;;  %v3924_v40 = vld [vmem:[%s5075_s4 + $0x60] sm:$0xff]  ;;  %5185 = vst [vmem:[#allocation29_spill] sm:$0xff] %v3987_v50  ;;  %5186 = vst [vmem:[#allocation30_spill] sm:$0xff] %v3993_v51  ;;  %v4006_v53 = vld [vmem:[%s5075_s4 + $0x28] sm:$0xff] }
  0x2b   :  { %2946 = vmatpush3.msra.mxu1 %v315_v56  ;;  %391 = vmatpush1.msra.mxu0 %v310_v57  ;;  %5175 = vst [vmem:[#allocation19_spill] sm:$0xff] %v3924_v40  ;;  %v4000_v52 = vld [vmem:[%s5075_s4] sm:$0xff]  ;;  %5188 = vst [vmem:[#allocation32_spill] sm:$0xff] %v4006_v53 }
  0x2c   :  { %2918 = vmatmul.mubr.msk.f32.gmra.mxu1 %vm58_vm0, %v43_v47  ;;  %2947 = vmatprep.subr.mxu1 %v5087_v3  ;;  %v3968_v47 = vld [vmem:[%s5075_s4 + $0x58] sm:$0xff]  ;;  %5187 = vst [vmem:[#allocation31_spill] sm:$0xff] %v4000_v52 }
  0x2d   :  { %392 = vmatprep.subr.mxu0 %v308_v58  ;;  %2948 = vmatpush3.msra.mxu1 %v312_v59  ;;  %5182 = vst [vmem:[#allocation26_spill] sm:$0xff] %v3968_v47 }
  0x2e   :  { %189 = vmatprep.mubr.f32.mxu0 %v5087_v3  ;;  %393 = vmatpush1.msra.mxu0 %v307_v60 }
  0x2f   :  { %2949 = vmatprep.subr.mxu1 %v5087_v3  ;;  %2671 = vmatmul.mubr.msk.f32.gmra.mxu0 %vm58_vm0, %v45_v61 }
  0x30   :  { %2920 = vmatprep.mubr.msk.f32.mxu1 %vm58_vm0, %v44_v54  ;;  %394 = vmatprep.subr.mxu0 %v305_v62  ;;  %v4015_v54 = vld [vmem:[%s5075_s4 + $0x10] sm:$0xff] }
  0x31   :  { %2950 = vmatpush3.msra.mxu1 %v309_v63  ;;  %395 = vmatpush1.msra.mxu0 %v304_v0  ;;  %5189 = vst [vmem:[#allocation33_spill] sm:$0xff] %v4015_v54 }
  0x32   :  { %2921 = vmatmul.mubr.msk.f32.gmra.mxu1 %vm58_vm0, %v45_v61  ;;  %2951 = vmatprep.subr.mxu1 %v5087_v3 }
  0x33   :  { %396 = vmatprep.subr.mxu0 %v302_v1  ;;  %2952 = vmatpush3.msra.mxu1 %v306_v2 }
  0x34   :  { %397 = vmatpush1.msra.mxu0 %v301_v4  ;;  %430 = vmatprep.mubr.f32.mxu0 %v5087_v3 }
  0x35   :  { %2953 = vmatprep.subr.mxu1 %v5087_v3  ;;  %431 = vmatmul.mubr.f32.vlgmr.msra.gmra.mxu0 %v3705_v5 }
  0x36   :  { %2954 = vmatpush3.msra.mxu1 %v303_v6  ;;  %2955 = vmatprep.mubr.msk.f32.mxu1 %vm3401_vm1, %v5087_v3 }
  0x37   :  { %623 = vmatprep.subr.mxu0 %v3714_v7  ;;  %2956 = vmatmul.mubr.f32.vlgmr.msra.gmra.mxu1 %v3705_v5 }
  0x38   :  { %624 = vmatpush1.msra.mxu0 %v3721_v8  ;;  %687 = vmatprep.mubr.f32.mxu0 %v5087_v3 }
  0x39   :  { %625 = vmatprep.subr.mxu0 %v3728_v9  ;;  %2958 = vmatprep.subr.mxu1 %v5087_v3 }
  0x3a   :  { %626 = vmatpush1.msra.mxu0 %v3735_v10  ;;  %2959 = vmatpush3.msra.mxu1 %v3740_v11 }
  0x3b   :  { %627 = vmatprep.subr.mxu0 %v3746_v12  ;;  %2960 = vmatprep.subr.mxu1 %v5087_v3 }
  0x3c   :  { %628 = vmatpush1.msra.mxu0 %v3753_v13  ;;  %2961 = vmatpush3.msra.mxu1 %v3759_v14 }
  0x3d   :  { %629 = vmatprep.subr.mxu0 %v3765_v15  ;;  %2962 = vmatprep.subr.mxu1 %v5087_v3 }
  0x3e   :  { %630 = vmatpush1.msra.mxu0 %v3772_v16  ;;  %2963 = vmatpush3.msra.mxu1 %v3778_v17 }
  0x3f   :  { %631 = vmatprep.subr.mxu0 %v3784_v18  ;;  %2964 = vmatprep.subr.mxu1 %v5087_v3 }
  0x40   :  { %632 = vmatpush1.msra.mxu0 %v3791_v19  ;;  %2965 = vmatpush3.msra.mxu1 %v3797_v20 }
  0x41   :  { %633 = vmatprep.subr.mxu0 %v3803_v21  ;;  %2966 = vmatprep.subr.mxu1 %v5087_v3 }
  0x42   :  { %634 = vmatpush1.msra.mxu0 %v3810_v22  ;;  %2967 = vmatpush3.msra.mxu1 %v3816_v23 }
  0x43   :  { %635 = vmatprep.subr.mxu0 %v3822_v24  ;;  %2968 = vmatprep.subr.mxu1 %v5087_v3 }
  0x44   :  { %636 = vmatpush1.msra.mxu0 %v3829_v25  ;;  %2969 = vmatpush3.msra.mxu1 %v3835_v26 }
  0x45   :  { %637 = vmatprep.subr.mxu0 %v3841_v27  ;;  %2970 = vmatprep.subr.mxu1 %v5087_v3 }
  0x46   :  { %638 = vmatpush1.msra.mxu0 %v3848_v28  ;;  %2971 = vmatpush3.msra.mxu1 %v3854_v29 }
  0x47   :  { %639 = vmatprep.subr.mxu0 %v3860_v30  ;;  %2972 = vmatprep.subr.mxu1 %v5087_v3 }
  0x48   :  { %640 = vmatpush1.msra.mxu0 %v3867_v31  ;;  %2973 = vmatpush3.msra.mxu1 %v3873_v32 }
  0x49   :  { %641 = vmatprep.subr.mxu0 %v3879_v33  ;;  %2974 = vmatprep.subr.mxu1 %v5087_v3 }
  0x4a   :  { %642 = vmatpush1.msra.mxu0 %v3886_v34  ;;  %2975 = vmatpush3.msra.mxu1 %v3892_v35 }
  0x4b   :  { %643 = vmatprep.subr.mxu0 %v3898_v36  ;;  %2976 = vmatprep.subr.mxu1 %v5087_v3 }
  0x4c   :  { %644 = vmatpush1.msra.mxu0 %v3905_v37  ;;  %2977 = vmatpush3.msra.mxu1 %v3911_v38 }
  0x4d   :  { %645 = vmatprep.subr.mxu0 %v3917_v39  ;;  %2978 = vmatprep.subr.mxu1 %v5087_v3 }
  0x4e   :  { %646 = vmatpush1.msra.mxu0 %v3924_v40  ;;  %2979 = vmatpush3.msra.mxu1 %v3930_v41 }
  0x4f   :  { %647 = vmatprep.subr.mxu0 %v3936_v42  ;;  %2980 = vmatprep.subr.mxu1 %v5087_v3 }
  0x50   :  { %648 = vmatpush1.msra.mxu0 %v3943_v43  ;;  %2981 = vmatpush3.msra.mxu1 %v3949_v44 }
  0x51   :  { %649 = vmatprep.subr.mxu0 %v3955_v45  ;;  %2982 = vmatprep.subr.mxu1 %v5087_v3 }
  0x52   :  { %650 = vmatpush1.msra.mxu0 %v3962_v46  ;;  %2983 = vmatpush3.msra.mxu1 %v3968_v47 }
  0x53   :  { %651 = vmatprep.subr.mxu0 %v3974_v48  ;;  %2984 = vmatprep.subr.mxu1 %v5087_v3 }
  0x54   :  { %652 = vmatpush1.msra.mxu0 %v3981_v49  ;;  %2985 = vmatpush3.msra.mxu1 %v3987_v50 }
  0x55   :  { %653 = vmatprep.subr.mxu0 %v3993_v51  ;;  %2986 = vmatprep.subr.mxu1 %v5087_v3 }
  0x56   :  { %654 = vmatpush1.msra.mxu0 %v4000_v52  ;;  %2987 = vmatpush3.msra.mxu1 %v4006_v53 }
  0x57   :  { %688 = vmatmul.mubr.f32.vlgmr.msra.gmra.mxu0 %v3705_v5  ;;  %2988 = vmatprep.subr.mxu1 %v5087_v3 }
  0x58   :  { %2989 = vmatpush3.msra.mxu1 %v4015_v54  ;;  %2990 = vmatprep.mubr.msk.f32.mxu1 %vm3401_vm1, %v5087_v3 }
  0x59   :  { %2991 = vmatmul.mubr.f32.vlgmr.msra.gmra.mxu1 %v3705_v5  ;;  %855 = vmatprep.subr.mxu0 %v3714_v7 }
  0x5a   :  { %2993 = vmatprep.subr.mxu1 %v5087_v3  ;;  %856 = vmatpush1.msra.mxu0 %v3721_v8 }
  0x5b   :  { %2994 = vmatpush3.msra.mxu1 %v3740_v11  ;;  %857 = vmatprep.subr.mxu0 %v3728_v9 }
  0x5c   :  { %2995 = vmatprep.subr.mxu1 %v5087_v3  ;;  %858 = vmatpush1.msra.mxu0 %v3735_v10 }
  0x5d   :  { %2996 = vmatpush3.msra.mxu1 %v3759_v14  ;;  %859 = vmatprep.subr.mxu0 %v3746_v12 }
  0x5e   :  { %2997 = vmatprep.subr.mxu1 %v5087_v3  ;;  %860 = vmatpush1.msra.mxu0 %v3753_v13 }
  0x5f   :  { %2998 = vmatpush3.msra.mxu1 %v3778_v17  ;;  %861 = vmatprep.subr.mxu0 %v3765_v15 }
  0x60   :  { %2999 = vmatprep.subr.mxu1 %v5087_v3  ;;  %862 = vmatpush1.msra.mxu0 %v3772_v16 }
  0x61   :  { %3000 = vmatpush3.msra.mxu1 %v3797_v20  ;;  %863 = vmatprep.subr.mxu0 %v3784_v18 }
  0x62   :  { %3001 = vmatprep.subr.mxu1 %v5087_v3  ;;  %864 = vmatpush1.msra.mxu0 %v3791_v19 }
  0x63   :  { %3002 = vmatpush3.msra.mxu1 %v3816_v23  ;;  %865 = vmatprep.subr.mxu0 %v3803_v21 }
  0x64   :  { %3003 = vmatprep.subr.mxu1 %v5087_v3  ;;  %866 = vmatpush1.msra.mxu0 %v3810_v22 }
  0x65   :  { %3004 = vmatpush3.msra.mxu1 %v3835_v26  ;;  %867 = vmatprep.subr.mxu0 %v3822_v24 }
  0x66   :  { %3005 = vmatprep.subr.mxu1 %v5087_v3  ;;  %868 = vmatpush1.msra.mxu0 %v3829_v25 }
  0x67   :  { %3006 = vmatpush3.msra.mxu1 %v3854_v29  ;;  %869 = vmatprep.subr.mxu0 %v3841_v27 }
  0x68   :  { %3007 = vmatprep.subr.mxu1 %v5087_v3  ;;  %870 = vmatpush1.msra.mxu0 %v3848_v28 }
  0x69   :  { %3008 = vmatpush3.msra.mxu1 %v3873_v32  ;;  %871 = vmatprep.subr.mxu0 %v3860_v30 }
  0x6a   :  { %3009 = vmatprep.subr.mxu1 %v5087_v3  ;;  %872 = vmatpush1.msra.mxu0 %v3867_v31 }
  0x6b   :  { %3010 = vmatpush3.msra.mxu1 %v3892_v35  ;;  %873 = vmatprep.subr.mxu0 %v3879_v33 }
  0x6c   :  { %3011 = vmatprep.subr.mxu1 %v5087_v3  ;;  %874 = vmatpush1.msra.mxu0 %v3886_v34 }
  0x6d   :  { %3012 = vmatpush3.msra.mxu1 %v3911_v38  ;;  %875 = vmatprep.subr.mxu0 %v3898_v36 }
  0x6e   :  { %3013 = vmatprep.subr.mxu1 %v5087_v3  ;;  %876 = vmatpush1.msra.mxu0 %v3905_v37 }
  0x6f   :  { %3014 = vmatpush3.msra.mxu1 %v3930_v41  ;;  %877 = vmatprep.subr.mxu0 %v3917_v39 }
  0x70   :  { %3015 = vmatprep.subr.mxu1 %v5087_v3  ;;  %878 = vmatpush1.msra.mxu0 %v3924_v40 }
  0x71   :  { %3016 = vmatpush3.msra.mxu1 %v3949_v44  ;;  %879 = vmatprep.subr.mxu0 %v3936_v42 }
  0x72   :  { %3017 = vmatprep.subr.mxu1 %v5087_v3  ;;  %880 = vmatpush1.msra.mxu0 %v3943_v43 }
  0x73   :  { %3018 = vmatpush3.msra.mxu1 %v3968_v47  ;;  %881 = vmatprep.subr.mxu0 %v3955_v45  ;;  %v349_v45 = vld [vmem:[%s5076_s5] sm:$0x7] }
  0x74   :  { %3019 = vmatprep.subr.mxu1 %v5087_v3  ;;  %882 = vmatpush1.msra.mxu0 %v3962_v46 }
  0x75   :  { %3020 = vmatpush3.msra.mxu1 %v3987_v50  ;;  %883 = vmatprep.subr.mxu0 %v3974_v48 }
  0x76   :  { %3021 = vmatprep.subr.mxu1 %v5087_v3  ;;  %884 = vmatpush1.msra.mxu0 %v3981_v49 }
  0x77   :  { %3022 = vmatpush3.msra.mxu1 %v4006_v53  ;;  %885 = vmatprep.subr.mxu0 %v3993_v51 }
  0x78   :  { %3023 = vmatprep.subr.mxu1 %v5087_v3  ;;  %886 = vmatpush1.msra.mxu0 %v4000_v52 }
  0x79   :  { %919 = vmatprep.mubr.f32.mxu0 %v5087_v3  ;;  %3024 = vmatpush3.msra.mxu1 %v4015_v54 }
  0x7a   :  { %3025 = vmatprep.mubr.msk.f32.mxu1 %vm3401_vm1, %v5087_v3  ;;  %1088 = vmatprep.subr.mxu0 %v3714_v7  ;;  %v351_v7 = vlaneseq }
  0x7b   :  { %3028 = vmatprep.subr.mxu1 %v5087_v3 }
  0x7c   :  { %v352_v51 = vshrl.u32 %v351_v7, 7 }
  0x7e   :  { %v4098_v50 = vsub.s32 0, %v352_v51  ;;  %v4103_v47 = vsub.s32 2, %v352_v51  ;;  %v4105_v43 = vsub.s32 1, %v352_v51 }
  0x80   :  { %5190 = vst [vmem:[#allocation34_spill] sm:$0xff] %v4098_v50  ;;  %5191 = vst [vmem:[#allocation35_spill] sm:$0xff] %v4105_v43  ;;  %v354_v40 = vrot.slane %v349_v45, %v4098_v50  ;;  %v362_v7 = vrot.slane %v349_v45, %v4103_v47  ;;  %v358_v41 = vrot.slane %v349_v45, %v4105_v43 }
  0xca   :  { %v4094_v55 = vpop.f32.mrf.mxu0 }
  0xcc   :  { %v4096_v56 = vpop.f32.mrf.mxu0  ;;  %v2913_v0 = vpop.f32.mrf.mxu1 }
  0xce   :  { %v262_v2 = vpop.f32.mrf.mxu1 }
  0xcf   :  { %v155_v57 = vpop.f32.mrf.mxu0 }
  0xd1   :  { %v157_v58 = vpop.f32.mrf.mxu0 }
  0xd4   :  { %v161_v59 = vpop.f32.mrf.mxu0 }
  0xd6   :  { %v163_v60 = vpop.f32.mrf.mxu0 }
  0xd9   :  { %v167_v61 = vpop.f32.mrf.mxu0 }
  0xdb   :  { %v169_v62 = vpop.f32.mrf.mxu0 }
  0xde   :  { %v173_v63 = vpop.f32.mrf.mxu0 }
  0xe0   :  { %v175_v1 = vpop.f32.mrf.mxu0 }
  0xe3   :  { %v179_v4 = vpop.f32.mrf.mxu0 }
  0xe5   :  { %v181_v6 = vpop.f32.mrf.mxu0 }
  0xe6   :  { %v2916_v54 = vpop.f32.mrf.mxu1 }
  0xe8   :  { %v272_v52 = vpop.f32.mrf.mxu1 }
  0xe9   :  { %v185_v3 = vpop.f32.mrf.mxu0 }
  0xeb   :  { %v187_v53 = vpop.f32.mrf.mxu0 }
  0xec   :  { %v2919_v49 = vpop.f32.mrf.mxu1 }
  0xee   :  { %v282_v48 = vpop.f32.mrf.mxu1 }
  0xef   :  { %v191_v46 = vpop.f32.mrf.mxu0 }
  0xf1   :  { %v193_v42 = vpop.f32.mrf.mxu0 }
  0xf2   :  { %v2922_v44 = vpop.f32.mrf.mxu1 }
  0xf4   :  { %v292_v39 = vpop.f32.mrf.mxu1 }
  0xf5   :  { %v432_v37 = vpop.f32.mrf.mxu0 }
  0xf6   :  { %v433_v36 = vadd.f32 %v432_v37, %v354_v40 }
  0xf7   :  { %v503_v38 = vpop.f32.mrf.mxu1  ;;  %v434_v34 = vpop.f32.mrf.mxu0 }
  0xf8   :  { %v504_v33 = vadd.f32 %v503_v38, %v362_v7  ;;  %v435_v35 = vadd.f32 %v434_v34, %v358_v41  ;;  %v4110_v31 = vadd.f32 %v433_v36, %v155_v57  ;;  %v4112_v51 = vadd.f32 %v433_v36, %v161_v59 }
  0xf9   :  { %v2957_v30 = vpop.f32.mrf.mxu1  ;;  %v4114_v32 = vadd.f32 %v433_v36, %v167_v61  ;;  %v4116_v28 = vadd.f32 %v433_v36, %v173_v63  ;;  %v4118_v27 = vadd.f32 %v433_v36, %v179_v4  ;;  %v4140_v61 = vadd.f32 %v433_v36, %v185_v3 }
  0xfa   :  { %5192 = vst [vmem:[#allocation36_spill] sm:$0xff] %v4112_v51  ;;  %v509_v29 = vadd.f32 %v504_v33, %v262_v2  ;;  %v4120_v25 = vadd.f32 %v2913_v0, %v504_v33  ;;  %v4122_v45 = vadd.f32 %v435_v35, %v157_v58  ;;  %v4124_v37 = vadd.f32 %v504_v33, %v272_v52 }
  0xfb   :  { %5193 = vst [vmem:[#allocation37_spill] sm:$0xff] %v4114_v32  ;;  %5194 = vst [vmem:[#allocation38_spill] sm:$0xff] %v4116_v28  ;;  %v4126_v38 = vadd.f32 %v435_v35, %v163_v60  ;;  %v4128_v34 = vadd.f32 %v2916_v54, %v504_v33  ;;  %v4130_v30 = vadd.f32 %v435_v35, %v169_v62 }
  0xfc   :  { %5195 = vst [vmem:[#allocation39_spill] sm:$0xff] %v4118_v27  ;;  %5196 = vst [vmem:[#allocation40_spill] sm:$0xff] %v4124_v37  ;;  %v4132_v40 = vadd.f32 %v504_v33, %v282_v48  ;;  %v4134_v41 = vadd.f32 %v435_v35, %v175_v1  ;;  %v4136_v57 = vadd.f32 %v2919_v49, %v504_v33  ;;  %v606_v48 = vld [vmem:[%s5077_s6] sm:$0x7] }
  0xfd   :  { %5197 = vst [vmem:[#allocation41_spill] sm:$0xff] %v4126_v38  ;;  %5198 = vst [vmem:[#allocation42_spill] sm:$0xff] %v4128_v34  ;;  %v4138_v59 = vadd.f32 %v435_v35, %v181_v6  ;;  %v4142_v58 = vadd.f32 %v504_v33, %v292_v39  ;;  %v4144_v52 = vadd.f32 %v435_v35, %v187_v53 }
  0xfe   :  { %5199 = vst [vmem:[#allocation43_spill] sm:$0xff] %v4130_v30  ;;  %5200 = vst [vmem:[#allocation44_spill] sm:$0xff] %v4132_v40  ;;  %v4146_v60 = vadd.f32 %v433_v36, %v191_v46  ;;  %v4148_v54 = vadd.f32 %v2922_v44, %v504_v33  ;;  %v4150_v62 = vadd.f32 %v435_v35, %v193_v42 }
  0xff   :  { %5201 = vst [vmem:[#allocation45_spill] sm:$0xff] %v4134_v41  ;;  %5202 = vst [vmem:[#allocation46_spill] sm:$0xff] %v4136_v57  ;;  %v611_v49 = vrot.slane %v606_v48, %v4098_v50  ;;  %v507_v3 = vadd.f32 %v433_v36, %v4094_v55  ;;  %v615_v39 = vrot.slane %v606_v48, %v4105_v43 }
 0x100   :  { %5203 = vst [vmem:[#allocation47_spill] sm:$0xff] %v4138_v59  ;;  %5204 = vst [vmem:[#allocation48_spill] sm:$0xff] %v4140_v61  ;;  %v508_v42 = vadd.f32 %v435_v35, %v4096_v56  ;;  %v619_v36 = vrot.slane %v606_v48, %v4103_v47  ;;  %v5215_v48 = vld [vmem:[#allocation7_spill] sm:$0xff] }
 0x101   :  { %5205 = vst [vmem:[#allocation49_spill] sm:$0xff] %v4142_v58  ;;  %5206 = vst [vmem:[#allocation50_spill] sm:$0xff] %v4144_v52  ;;  %v5235_v58 = vld [vmem:[#allocation27_spill] sm:$0xff]  ;;  %v5238_v52 = vld [vmem:[#allocation30_spill] sm:$0xff] }
 0x102   :  { %5207 = vst [vmem:[#allocation51_spill] sm:$0xff] %v4146_v60  ;;  %5208 = vst [vmem:[#allocation52_spill] sm:$0xff] %v4148_v54  ;;  %v5234_v60 = vld [vmem:[#allocation29_spill] sm:$0xff] }
 0x103   :  { %5209 = vst [vmem:[#allocation53_spill] sm:$0xff] %v4150_v62 }
 0x117   :  { %v689_v63 = vpop.f32.mrf.mxu0 }
 0x118   :  { %v690_v0 = vadd.f32 %v689_v63, %v611_v49 }
 0x119   :  { %v691_v53 = vpop.f32.mrf.mxu0  ;;  %v760_v1 = vpop.f32.mrf.mxu1 }
 0x11a   :  { %v764_v46 = vadd.f32 %v690_v0, %v507_v3  ;;  %v692_v44 = vadd.f32 %v691_v53, %v615_v39  ;;  %v761_v63 = vadd.f32 %v760_v1, %v619_v36  ;;  %v5216_v1 = vld [vmem:[#allocation11_spill] sm:$0xff] }
 0x11b   :  { %v2992_v2 = vpop.f32.mrf.mxu1  ;;  %v5223_v36 = vld [vmem:[#allocation15_spill] sm:$0xff] }
 0x11c   :  { %v2680_v33 = vmul.f32 -1.442695, %v764_v46  ;;  %v771_v4 = vadd.f32 %v692_v44, %v508_v42  ;;  %v5218_v44 = vld [vmem:[#allocation10_spill] sm:$0xff] }
 0x11d   :  { %v5219_v42 = vld [vmem:[#allocation14_spill] sm:$0xff] }
 0x11e   :  { %3319 = vpow2.f32 %v2680_v33  ;;  %v2681_v6 = vmul.f32 -1.442695, %v771_v4  ;;  %v5217_v33 = vld [vmem:[#allocation9_spill] sm:$0xff]  ;;  %v5220_v4 = vld [vmem:[#allocation12_spill] sm:$0xff] }
 0x120   :  { %3321 = vpow2.f32 %v2681_v6  ;;  %v5221_v6 = vld [vmem:[#allocation13_spill] sm:$0xff] }
 0x12b   :  { %v3320_v7 = vpop.eup %3319 }
 0x12c   :  { %v768_v54 = vadd.f32 1.0, %v3320_v7  ;;  %v5222_v7 = vld [vmem:[#allocation17_spill] sm:$0xff] }
 0x12d   :  { %v3322_v55 = vpop.eup %3321 }
 0x12e   :  { %3323 = vrcp.f32 %v768_v54  ;;  %v775_v49 = vadd.f32 1.0, %v3322_v55  ;;  %v5213_v54 = vld [vmem:[#allocation8_spill] sm:$0xff] }
 0x12f   :  { %v5224_v55 = vld [vmem:[#allocation16_spill] sm:$0xff] }
 0x130   :  { %3325 = vrcp.f32 %v775_v49  ;;  %v5225_v49 = vld [vmem:[#allocation20_spill] sm:$0xff] }
 0x13b   :  { %v3324_v62 = vpop.eup %3323 }
 0x13c   :  { %v778_v3 = vmul.f32 %v3324_v62, %v761_v63  ;;  %v5214_v62 = vld [vmem:[#allocation6_spill] sm:$0xff] }
 0x13d   :  { %v3326_v39 = vpop.eup %3325  ;;  %v5226_v63 = vld [vmem:[#allocation18_spill] sm:$0xff] }
 0x13e   :  { %v779_v0 = vadd.f32 %v778_v3, %v509_v29  ;;  %v781_v53 = vsub.f32 1.0, %v3326_v39  ;;  %v783_v56 = vmul.f32 %v3326_v39, %v3705_v5  ;;  %v5211_v29 = vmov 0.0   ;;  %v5212_v5 = vld [vmem:[#allocation5_spill] sm:$0xff]  ;;  %v5227_v3 = vld [vmem:[#allocation19_spill] sm:$0xff] }
 0x13f   :  { %v5229_v39 = vld [vmem:[#allocation21_spill] sm:$0xff] }
 0x140   :  { %3327 = vtanh.f32 %v779_v0  ;;  %v5228_v0 = vld [vmem:[#allocation23_spill] sm:$0xff] }
 0x14d   :  { %v3328_v46 = vpop.eup %3327 }
 0x14e   :  { %v782_v35 = vmul.f32 %v3328_v46, %v781_v53  ;;  %v5230_v53 = vld [vmem:[#allocation22_spill] sm:$0xff] }
 0x14f   :  { %v5231_v46 = vld [vmem:[#allocation26_spill] sm:$0xff] }
 0x150   :  { %v4161_v2 = vadd.f32 %v783_v56, %v782_v35  ;;  %v5232_v35 = vld [vmem:[#allocation24_spill] sm:$0xff]  ;;  %v5233_v56 = vld [vmem:[#allocation25_spill] sm:$0xff] }
 0x152   :  { %5210 = vst [vmem:[#allocation54_spill] sm:$0xff] %v4161_v2  ;;  %920 = vmatmul.mubr.f32.vlgmr.msra.gmra.mxu0 %v4161_v2  ;;  %3026 = vmatmul.mubr.f32.vlgmr.msra.gmra.mxu1 %v4161_v2 }
 0x153   :  { %1089 = vmatpush1.msra.mxu0 %v3721_v8  ;;  %3029 = vmatpush3.msra.mxu1 %v3740_v11 }
 0x154   :  { %1090 = vmatprep.subr.mxu0 %v3728_v9  ;;  %3030 = vmatprep.subr.mxu1 %v5211_v29 }
 0x155   :  { %1091 = vmatpush1.msra.mxu0 %v3735_v10  ;;  %3031 = vmatpush3.msra.mxu1 %v3759_v14 }
 0x156   :  { %1092 = vmatprep.subr.mxu0 %v3746_v12  ;;  %3032 = vmatprep.subr.mxu1 %v5211_v29 }
 0x157   :  { %1093 = vmatpush1.msra.mxu0 %v3753_v13  ;;  %3033 = vmatpush3.msra.mxu1 %v3778_v17 }
 0x158   :  { %1094 = vmatprep.subr.mxu0 %v3765_v15  ;;  %3034 = vmatprep.subr.mxu1 %v5211_v29 }
 0x159   :  { %1095 = vmatpush1.msra.mxu0 %v3772_v16  ;;  %3035 = vmatpush3.msra.mxu1 %v3797_v20 }
 0x15a   :  { %1096 = vmatprep.subr.mxu0 %v3784_v18  ;;  %3036 = vmatprep.subr.mxu1 %v5211_v29 }
 0x15b   :  { %1097 = vmatpush1.msra.mxu0 %v3791_v19  ;;  %3037 = vmatpush3.msra.mxu1 %v3816_v23 }
 0x15c   :  { %1098 = vmatprep.subr.mxu0 %v3803_v21  ;;  %3038 = vmatprep.subr.mxu1 %v5211_v29 }
 0x15d   :  { %1099 = vmatpush1.msra.mxu0 %v3810_v22  ;;  %3039 = vmatpush3.msra.mxu1 %v3835_v26 }
 0x15e   :  { %1100 = vmatprep.subr.mxu0 %v3822_v24  ;;  %3040 = vmatprep.subr.mxu1 %v5211_v29 }
 0x15f   :  { %1101 = vmatpush1.msra.mxu0 %v5212_v5  ;;  %3041 = vmatpush3.msra.mxu1 %v5213_v54 }
 0x160   :  { %1102 = vmatprep.subr.mxu0 %v5214_v62  ;;  %3042 = vmatprep.subr.mxu1 %v5211_v29 }
 0x161   :  { %1103 = vmatpush1.msra.mxu0 %v5215_v48  ;;  %3043 = vmatpush3.msra.mxu1 %v5216_v1 }
 0x162   :  { %1104 = vmatprep.subr.mxu0 %v5217_v33  ;;  %3044 = vmatprep.subr.mxu1 %v5211_v29 }
 0x163   :  { %1105 = vmatpush1.msra.mxu0 %v5218_v44  ;;  %3045 = vmatpush3.msra.mxu1 %v5219_v42 }
 0x164   :  { %1106 = vmatprep.subr.mxu0 %v5220_v4  ;;  %3046 = vmatprep.subr.mxu1 %v5211_v29 }
 0x165   :  { %1107 = vmatpush1.msra.mxu0 %v5221_v6  ;;  %3047 = vmatpush3.msra.mxu1 %v5222_v7 }
 0x166   :  { %1108 = vmatprep.subr.mxu0 %v5223_v36  ;;  %3048 = vmatprep.subr.mxu1 %v5211_v29 }
 0x167   :  { %1109 = vmatpush1.msra.mxu0 %v5224_v55  ;;  %3049 = vmatpush3.msra.mxu1 %v5225_v49 }
 0x168   :  { %1110 = vmatprep.subr.mxu0 %v5226_v63  ;;  %3050 = vmatprep.subr.mxu1 %v5211_v29 }
 0x169   :  { %1111 = vmatpush1.msra.mxu0 %v5227_v3  ;;  %3051 = vmatpush3.msra.mxu1 %v5228_v0  ;;  %v5236_v3 = vld [vmem:[#allocation28_spill] sm:$0xff] }
 0x16a   :  { %1112 = vmatprep.subr.mxu0 %v5229_v39  ;;  %3052 = vmatprep.subr.mxu1 %v5211_v29  ;;  %v5237_v39 = vld [vmem:[#allocation32_spill] sm:$0xff] }
 0x16b   :  { %1113 = vmatpush1.msra.mxu0 %v5230_v53  ;;  %3053 = vmatpush3.msra.mxu1 %v5231_v46  ;;  %v5239_v53 = vld [vmem:[#allocation31_spill] sm:$0xff] }
 0x16c   :  { %1114 = vmatprep.subr.mxu0 %v5232_v35  ;;  %3054 = vmatprep.subr.mxu1 %v5211_v29  ;;  %v5240_v35 = vld [vmem:[#allocation33_spill] sm:$0xff] }
 0x16d   :  { %1115 = vmatpush1.msra.mxu0 %v5233_v56  ;;  %3055 = vmatpush3.msra.mxu1 %v5234_v60  ;;  %v838_v56 = vld [vmem:[%s5077_s6] sm:$0x7] }
 0x16e   :  { %1116 = vmatprep.subr.mxu0 %v5235_v58  ;;  %3056 = vmatprep.subr.mxu1 %v5211_v29  ;;  %v5241_v58 = vld [vmem:[#allocation4_spill] sm:$0xff]  ;;  %v847_v57 = vrot.slane %v838_v56, %v4105_v43  ;;  %v851_v38 = vrot.slane %v838_v56, %v4103_v47 }
 0x16f   :  { %1117 = vmatpush1.msra.mxu0 %v5236_v3  ;;  %3057 = vmatpush3.msra.mxu1 %v5237_v39 }
 0x170   :  { %1118 = vmatprep.subr.mxu0 %v5238_v52  ;;  %3058 = vmatprep.subr.mxu1 %v5211_v29  ;;  %v843_v52 = vrot.slane %v838_v56, %v4098_v50  ;;  %v4421_v56 = vld [vmem:[%s5075_s4 + $0x138] sm:$0xff] }
 0x171   :  { %1119 = vmatpush1.msra.mxu0 %v5239_v53  ;;  %1152 = vmatprep.mubr.f32.mxu0 %v5211_v29 }
 0x172   :  { %3059 = vmatpush3.msra.mxu1 %v5240_v35  ;;  %3060 = vmatprep.mubr.msk.f32.mxu1 %vm3401_vm1, %v5211_v29 }
 0x173   :  { %1321 = vmatprep.subr.mxu0 %v5241_v58  ;;  %3063 = vmatprep.subr.mxu1 %v5211_v29 }
 0x212   :  { %v921_v3 = vpop.f32.mrf.mxu0  ;;  %v992_v61 = vpop.f32.mrf.mxu1 }
 0x213   :  { %v922_v53 = vadd.f32 %v921_v3, %v843_v52  ;;  %v993_v3 = vadd.f32 %v992_v61, %v851_v38 }
 0x214   :  { %v923_v59 = vpop.f32.mrf.mxu0  ;;  %v3027_v27 = vpop.f32.mrf.mxu1 }
 0x215   :  { %v996_v40 = vadd.f32 %v922_v53, %v4110_v31  ;;  %v924_v28 = vadd.f32 %v923_v59, %v847_v57  ;;  %v4426_v53 = vld [vmem:[%s5075_s4 + $0x148] sm:$0xff] }
 0x217   :  { %v2682_v41 = vmul.f32 -1.442695, %v996_v40  ;;  %v1003_v58 = vadd.f32 %v924_v28, %v4122_v45 }
 0x219   :  { %3329 = vpow2.f32 %v2682_v41  ;;  %v2683_v34 = vmul.f32 -1.442695, %v1003_v58  ;;  %v4433_v58 = vld [vmem:[%s5075_s4 + $0x128] sm:$0xff] }
 0x21b   :  { %3331 = vpow2.f32 %v2683_v34 }
 0x226   :  { %v3330_v30 = vpop.eup %3329 }
 0x227   :  { %v1000_v32 = vadd.f32 1.0, %v3330_v30 }
 0x228   :  { %v3332_v37 = vpop.eup %3331 }
 0x229   :  { %3333 = vrcp.f32 %v1000_v32  ;;  %v1007_v52 = vadd.f32 1.0, %v3332_v37  ;;  %v5249_v37 = vld [vmem:[#allocation41_spill] sm:$0xff] }
 0x22b   :  { %3335 = vrcp.f32 %v1007_v52  ;;  %v4440_v52 = vld [vmem:[%s5075_s4 + $0x120] sm:$0xff] }
 0x236   :  { %v3334_v51 = vpop.eup %3333 }
 0x237   :  { %v1010_v43 = vmul.f32 %v3334_v51, %v993_v3  ;;  %v4445_v3 = vld [vmem:[%s5075_s4 + $0x130] sm:$0xff] }
 0x238   :  { %v3336_v31 = vpop.eup %3335 }
 0x239   :  { %v1011_v27 = vadd.f32 %v1010_v43, %v4120_v25  ;;  %v1013_v40 = vsub.f32 1.0, %v3336_v31  ;;  %v1015_v45 = vmul.f32 %v3336_v31, %v4161_v2  ;;  %v4459_v31 = vld [vmem:[%s5075_s4 + $0x108] sm:$0xff] }
 0x23b   :  { %3337 = vtanh.f32 %v1011_v27  ;;  %v4452_v27 = vld [vmem:[%s5075_s4 + $0x110] sm:$0xff] }
 0x248   :  { %v3338_v41 = vpop.eup %3337 }
 0x249   :  { %v1014_v28 = vmul.f32 %v3338_v41, %v1013_v40  ;;  %v4464_v40 = vld [vmem:[%s5075_s4 + $0x118] sm:$0xff] }
 0x24a   :  { %v4471_v41 = vld [vmem:[%s5075_s4 + $0xf8] sm:$0xff] }
 0x24b   :  { %v4242_v34 = vadd.f32 %v1015_v45, %v1014_v28  ;;  %v4478_v28 = vld [vmem:[%s5075_s4 + $0xf0] sm:$0xff]  ;;  %v4483_v45 = vld [vmem:[%s5075_s4 + $0x100] sm:$0xff] }
 0x24d   :  { %5242 = vst [vmem:[#allocation5_spill] sm:$0xff] %v4242_v34  ;;  %1153 = vmatmul.mubr.f32.vlgmr.msra.gmra.mxu0 %v4242_v34  ;;  %3061 = vmatmul.mubr.f32.vlgmr.msra.gmra.mxu1 %v4242_v34 }
 0x24e   :  { %1322 = vmatpush1.msra.mxu0 %v3721_v8  ;;  %3064 = vmatpush3.msra.mxu1 %v3740_v11  ;;  %v4306_v8 = vld [vmem:[%s5075_s4 + $0x60] sm:$0xff]  ;;  %v4322_v11 = vld [vmem:[%s5075_s4 + $0x38] sm:$0xff] }
 0x24f   :  { %1323 = vmatprep.subr.mxu0 %v3728_v9  ;;  %3065 = vmatprep.subr.mxu1 %v5211_v29  ;;  %v4311_v9 = vld [vmem:[%s5075_s4 + $0x50] sm:$0xff] }
 0x250   :  { %1324 = vmatpush1.msra.mxu0 %v3735_v10  ;;  %3066 = vmatpush3.msra.mxu1 %v3759_v14  ;;  %v4316_v10 = vld [vmem:[%s5075_s4 + $0x48] sm:$0xff]  ;;  %v4340_v14 = vld [vmem:[%s5075_s4 + $0x18] sm:$0xff] }
 0x251   :  { %1325 = vmatprep.subr.mxu0 %v3746_v12  ;;  %3067 = vmatprep.subr.mxu1 %v5211_v29  ;;  %v4328_v12 = vld [vmem:[%s5075_s4 + $0x30] sm:$0xff]  ;;  %5244 = vst [vmem:[#allocation6_spill] sm:$0xff] %v4340_v14 }
 0x252   :  { %1326 = vmatpush1.msra.mxu0 %v3753_v13  ;;  %3068 = vmatpush3.msra.mxu1 %v3778_v17  ;;  %v4334_v13 = vld [vmem:[%s5075_s4 + $0x20] sm:$0xff] }
 0x253   :  { %1327 = vmatprep.subr.mxu0 %v3765_v15  ;;  %3069 = vmatprep.subr.mxu1 %v5211_v29  ;;  %5243 = vst [vmem:[#allocation8_spill] sm:$0xff] %v4334_v13  ;;  %v4346_v15 = vld [vmem:[%s5075_s4 + $0x8] sm:$0xff]  ;;  %v1071_v17 = vld [vmem:[%s5077_s6] sm:$0x7] }
 0x254   :  { %1328 = vmatpush1.msra.mxu0 %v3772_v16  ;;  %3070 = vmatpush3.msra.mxu1 %v3797_v20  ;;  %5245 = vst [vmem:[#allocation7_spill] sm:$0xff] %v4346_v15  ;;  %v4352_v16 = vld [vmem:[%s5075_s4] sm:$0xff] }
 0x255   :  { %1329 = vmatprep.subr.mxu0 %v3784_v18  ;;  %3071 = vmatprep.subr.mxu1 %v5211_v29  ;;  %5246 = vst [vmem:[#allocation11_spill] sm:$0xff] %v4352_v16  ;;  %v1076_v18 = vrot.slane %v1071_v17, %v4098_v50 }
 0x256   :  { %1330 = vmatpush1.msra.mxu0 %v3791_v19  ;;  %3072 = vmatpush3.msra.mxu1 %v3816_v23 }
 0x257   :  { %1331 = vmatprep.subr.mxu0 %v3803_v21  ;;  %3073 = vmatprep.subr.mxu1 %v5211_v29 }
 0x258   :  { %1332 = vmatpush1.msra.mxu0 %v3810_v22  ;;  %3074 = vmatpush3.msra.mxu1 %v3835_v26  ;;  %v5247_v22 = vld [vmem:[#allocation35_spill] sm:$0xff]  ;;  %v5248_v26 = vld [vmem:[#allocation36_spill] sm:$0xff] }
 0x259   :  { %1333 = vmatprep.subr.mxu0 %v3822_v24  ;;  %3075 = vmatprep.subr.mxu1 %v5211_v29  ;;  %v1080_v23 = vrot.slane %v1071_v17, %v5247_v22 }
 0x25a   :  { %1334 = vmatpush1.msra.mxu0 %v5212_v5  ;;  %3076 = vmatpush3.msra.mxu1 %v5213_v54 }
 0x25b   :  { %1335 = vmatprep.subr.mxu0 %v5214_v62  ;;  %3077 = vmatprep.subr.mxu1 %v5211_v29 }
 0x25c   :  { %1336 = vmatpush1.msra.mxu0 %v5215_v48  ;;  %3078 = vmatpush3.msra.mxu1 %v5216_v1  ;;  %v5250_v1 = vld [vmem:[#allocation40_spill] sm:$0xff] }
 0x25d   :  { %1337 = vmatprep.subr.mxu0 %v5217_v33  ;;  %3079 = vmatprep.subr.mxu1 %v5211_v29 }
 0x25e   :  { %1338 = vmatpush1.msra.mxu0 %v5218_v44  ;;  %3080 = vmatpush3.msra.mxu1 %v5219_v42 }
 0x25f   :  { %1339 = vmatprep.subr.mxu0 %v5220_v4  ;;  %3081 = vmatprep.subr.mxu1 %v5211_v29 }
 0x260   :  { %1340 = vmatpush1.msra.mxu0 %v5221_v6  ;;  %3082 = vmatpush3.msra.mxu1 %v5222_v7 }
 0x261   :  { %1341 = vmatprep.subr.mxu0 %v5223_v36  ;;  %3083 = vmatprep.subr.mxu1 %v5211_v29 }
 0x262   :  { %1342 = vmatpush1.msra.mxu0 %v5224_v55  ;;  %3084 = vmatpush3.msra.mxu1 %v5225_v49  ;;  %v4377_v55 = vld [vmem:[%s5075_s4 + $0x170] sm:$0xff]  ;;  %v4383_v49 = vld [vmem:[%s5075_s4 + $0x168] sm:$0xff] }
 0x263   :  { %1343 = vmatprep.subr.mxu0 %v5226_v63  ;;  %3085 = vmatprep.subr.mxu1 %v5211_v29  ;;  %5252 = vst [vmem:[#allocation10_spill] sm:$0xff] %v4377_v55  ;;  %v4388_v63 = vld [vmem:[%s5075_s4 + $0x178] sm:$0xff] }
 0x264   :  { %3086 = vmatpush3.msra.mxu1 %v5228_v0  ;;  %1385 = vmatprep.mubr.f32.mxu0 %v5211_v29  ;;  %v4395_v0 = vld [vmem:[%s5075_s4 + $0x158] sm:$0xff] }
 0x265   :  { %3087 = vmatprep.subr.mxu1 %v5211_v29  ;;  %3095 = vmatprep.mubr.msk.f32.mxu1 %vm3401_vm1, %v5211_v29 }
 0x266   :  { %3088 = vmatpush3.msra.mxu1 %v5231_v46  ;;  %1344 = vmatpush1.msra.mxu0 %v4306_v8  ;;  %v4402_v46 = vld [vmem:[%s5075_s4 + $0x150] sm:$0xff] }
 0x267   :  { %3089 = vmatprep.subr.mxu1 %v5211_v29  ;;  %1345 = vmatprep.subr.mxu0 %v4311_v9 }
 0x268   :  { %3090 = vmatpush3.msra.mxu1 %v5234_v60  ;;  %1346 = vmatpush1.msra.mxu0 %v4316_v10  ;;  %v1084_v60 = vrot.slane %v1071_v17, %v4103_v47  ;;  %v4490_v17 = vld [vmem:[%s5075_s4 + $0xe0] sm:$0xff] }
 0x269   :  { %3091 = vmatprep.subr.mxu1 %v5211_v29  ;;  %1347 = vmatprep.subr.mxu0 %v4322_v11 }
 0x26a   :  { %3092 = vmatpush3.msra.mxu1 %v5237_v39  ;;  %1348 = vmatpush1.msra.mxu0 %v4328_v12  ;;  %v4407_v39 = vld [vmem:[%s5075_s4 + $0x160] sm:$0xff] }
 0x26b   :  { %3093 = vmatprep.subr.mxu1 %v5211_v29  ;;  %1349 = vmatprep.subr.mxu0 %v4334_v13 }
 0x26c   :  { %3094 = vmatpush3.msra.mxu1 %v5240_v35  ;;  %1350 = vmatpush1.msra.mxu0 %v4340_v14  ;;  %v4414_v35 = vld [vmem:[%s5075_s4 + $0x140] sm:$0xff] }
 0x26d   :  { %3098 = vmatprep.subr.mxu1 %v5211_v29  ;;  %1351 = vmatprep.subr.mxu0 %v4346_v15 }
 0x26e   :  { %1352 = vmatpush1.msra.mxu0 %v4352_v16 }
 0x26f   :  { %1554 = vmatprep.subr.mxu0 %v4377_v55 }
 0x30d   :  { %v1154_v19 = vpop.f32.mrf.mxu0  ;;  %v1225_v20 = vpop.f32.mrf.mxu1 }
 0x30e   :  { %v1155_v21 = vadd.f32 %v1154_v19, %v1076_v18  ;;  %v1226_v54 = vadd.f32 %v1225_v20, %v1084_v60  ;;  %v4497_v18 = vld [vmem:[%s5075_s4 + $0xd8] sm:$0xff]  ;;  %v4502_v19 = vld [vmem:[%s5075_s4 + $0xe8] sm:$0xff]  ;;  %v4606_v60 = vld [vmem:[%s5075_s4 + $0x40] sm:$0xff] }
 0x30f   :  { %v1156_v24 = vpop.f32.mrf.mxu0  ;;  %v3062_v25 = vpop.f32.mrf.mxu1  ;;  %v4509_v20 = vld [vmem:[%s5075_s4 + $0xc8] sm:$0xff]  ;;  %5253 = vst [vmem:[#allocation14_spill] sm:$0xff] %v4606_v60 }
 0x310   :  { %v1229_v32 = vadd.f32 %v1155_v21, %v5248_v26  ;;  %v1157_v51 = vadd.f32 %v1156_v24, %v1080_v23  ;;  %v4516_v21 = vld [vmem:[%s5075_s4 + $0xc0] sm:$0xff]  ;;  %v4521_v23 = vld [vmem:[%s5075_s4 + $0xd0] sm:$0xff]  ;;  %v4533_v25 = vld [vmem:[%s5075_s4 + $0xa8] sm:$0xff] }
 0x311   :  { %v4526_v24 = vld [vmem:[%s5075_s4 + $0xb0] sm:$0xff]  ;;  %v4538_v26 = vld [vmem:[%s5075_s4 + $0xb8] sm:$0xff] }
 0x312   :  { %v2684_v43 = vmul.f32 -1.442695, %v1229_v32  ;;  %v1236_v38 = vadd.f32 %v1157_v51, %v5249_v37  ;;  %v4543_v32 = vld [vmem:[%s5075_s4 + $0x98] sm:$0xff]  ;;  %v4555_v51 = vld [vmem:[%s5075_s4 + $0xa0] sm:$0xff] }
 0x313   :  { %v4562_v37 = vld [vmem:[%s5075_s4 + $0x80] sm:$0xff] }
 0x314   :  { %3339 = vpow2.f32 %v2684_v43  ;;  %v2685_v30 = vmul.f32 -1.442695, %v1236_v38  ;;  %v4550_v43 = vld [vmem:[%s5075_s4 + $0x90] sm:$0xff]  ;;  %v4569_v38 = vld [vmem:[%s5075_s4 + $0x78] sm:$0xff] }
 0x316   :  { %3341 = vpow2.f32 %v2685_v30  ;;  %v4574_v30 = vld [vmem:[%s5075_s4 + $0x88] sm:$0xff] }
 0x321   :  { %v3340_v57 = vpop.eup %3339 }
 0x322   :  { %v1233_v59 = vadd.f32 1.0, %v3340_v57  ;;  %v4581_v57 = vld [vmem:[%s5075_s4 + $0x68] sm:$0xff] }
 0x323   :  { %v3342_v61 = vpop.eup %3341 }
 0x324   :  { %3343 = vrcp.f32 %v1233_v59  ;;  %v1240_v5 = vadd.f32 1.0, %v3342_v61  ;;  %v4588_v59 = vld [vmem:[%s5075_s4 + $0x70] sm:$0xff]  ;;  %v4597_v61 = vld [vmem:[%s5075_s4 + $0x58] sm:$0xff] }
 0x326   :  { %3345 = vrcp.f32 %v1240_v5  ;;  %v4615_v5 = vld [vmem:[%s5075_s4 + $0x28] sm:$0xff] }
 0x327   :  { %5254 = vst [vmem:[#allocation12_spill] sm:$0xff] %v4615_v5 }
 0x331   :  { %v3344_v62 = vpop.eup %3343 }
 0x332   :  { %v1243_v48 = vmul.f32 %v3344_v62, %v1226_v54  ;;  %v4624_v54 = vld [vmem:[%s5075_s4 + $0x10] sm:$0xff]  ;;  %v1304_v62 = vld [vmem:[%s5077_s6] sm:$0x7] }
 0x333   :  { %v3346_v44 = vpop.eup %3345  ;;  %5255 = vst [vmem:[#allocation13_spill] sm:$0xff] %v4624_v54 }
 0x334   :  { %v1244_v33 = vadd.f32 %v1243_v48, %v5250_v1  ;;  %v1246_v42 = vsub.f32 1.0, %v3346_v44  ;;  %v1248_v7 = vmul.f32 %v3346_v44, %v4242_v34  ;;  %v1309_v48 = vrot.slane %v1304_v62, %v4098_v50 }
 0x336   :  { %3347 = vtanh.f32 %v1244_v33 }
 0x343   :  { %v3348_v4 = vpop.eup %3347 }
 0x344   :  { %v1247_v6 = vmul.f32 %v3348_v4, %v1246_v42  ;;  %v1313_v42 = vrot.slane %v1304_v62, %v5247_v22 }
 0x346   :  { %v4367_v36 = vadd.f32 %v1248_v7, %v1247_v6  ;;  %v5256_v7 = vld [vmem:[#allocation37_spill] sm:$0xff] }
 0x348   :  { %5251 = vst [vmem:[#allocation9_spill] sm:$0xff] %v4367_v36  ;;  %1386 = vmatmul.mubr.f32.vlgmr.msra.gmra.mxu0 %v4367_v36  ;;  %3096 = vmatmul.mubr.f32.vlgmr.msra.gmra.mxu1 %v4367_v36 }
 0x349   :  { %1618 = vmatprep.mubr.f32.mxu0 %v5211_v29  ;;  %3130 = vmatprep.mubr.msk.f32.mxu1 %vm3401_vm1, %v5211_v29 }
 0x34a   :  { %1555 = vmatpush1.msra.mxu0 %v4383_v49  ;;  %3099 = vmatpush3.msra.mxu1 %v4388_v63 }
 0x34b   :  { %1556 = vmatprep.subr.mxu0 %v4395_v0  ;;  %3100 = vmatprep.subr.mxu1 %v5211_v29 }
 0x34c   :  { %1557 = vmatpush1.msra.mxu0 %v4402_v46  ;;  %3101 = vmatpush3.msra.mxu1 %v4407_v39 }
 0x34d   :  { %1558 = vmatprep.subr.mxu0 %v4414_v35  ;;  %3102 = vmatprep.subr.mxu1 %v5211_v29 }
 0x34e   :  { %1559 = vmatpush1.msra.mxu0 %v4421_v56  ;;  %3103 = vmatpush3.msra.mxu1 %v4426_v53 }
 0x34f   :  { %1560 = vmatprep.subr.mxu0 %v4433_v58  ;;  %3104 = vmatprep.subr.mxu1 %v5211_v29 }
 0x350   :  { %1561 = vmatpush1.msra.mxu0 %v4440_v52  ;;  %3105 = vmatpush3.msra.mxu1 %v4445_v3 }
 0x351   :  { %1562 = vmatprep.subr.mxu0 %v4452_v27  ;;  %3106 = vmatprep.subr.mxu1 %v5211_v29 }
 0x352   :  { %1563 = vmatpush1.msra.mxu0 %v4459_v31  ;;  %3107 = vmatpush3.msra.mxu1 %v4464_v40 }
 0x353   :  { %1564 = vmatprep.subr.mxu0 %v4471_v41  ;;  %3108 = vmatprep.subr.mxu1 %v5211_v29 }
 0x354   :  { %1565 = vmatpush1.msra.mxu0 %v4478_v28  ;;  %3109 = vmatpush3.msra.mxu1 %v4483_v45 }
 0x355   :  { %1566 = vmatprep.subr.mxu0 %v4490_v17  ;;  %3110 = vmatprep.subr.mxu1 %v5211_v29 }
 0x356   :  { %1567 = vmatpush1.msra.mxu0 %v4497_v18  ;;  %3111 = vmatpush3.msra.mxu1 %v4502_v19 }
 0x357   :  { %1568 = vmatprep.subr.mxu0 %v4509_v20  ;;  %3112 = vmatprep.subr.mxu1 %v5211_v29 }
 0x358   :  { %1569 = vmatpush1.msra.mxu0 %v4516_v21  ;;  %3113 = vmatpush3.msra.mxu1 %v4521_v23 }
 0x359   :  { %1570 = vmatprep.subr.mxu0 %v4526_v24  ;;  %3114 = vmatprep.subr.mxu1 %v5211_v29 }
 0x35a   :  { %1571 = vmatpush1.msra.mxu0 %v4533_v25  ;;  %3115 = vmatpush3.msra.mxu1 %v4538_v26 }
 0x35b   :  { %1572 = vmatprep.subr.mxu0 %v4543_v32  ;;  %3116 = vmatprep.subr.mxu1 %v5211_v29 }
 0x35c   :  { %1573 = vmatpush1.msra.mxu0 %v4550_v43  ;;  %3117 = vmatpush3.msra.mxu1 %v4555_v51 }
 0x35d   :  { %1574 = vmatprep.subr.mxu0 %v4562_v37  ;;  %3118 = vmatprep.subr.mxu1 %v5211_v29 }
 0x35e   :  { %1575 = vmatpush1.msra.mxu0 %v4569_v38  ;;  %3119 = vmatpush3.msra.mxu1 %v4574_v30 }
 0x35f   :  { %1576 = vmatprep.subr.mxu0 %v4581_v57  ;;  %3120 = vmatprep.subr.mxu1 %v5211_v29 }
 0x360   :  { %1577 = vmatpush1.msra.mxu0 %v4306_v8  ;;  %3121 = vmatpush3.msra.mxu1 %v4588_v59 }
 0x361   :  { %1578 = vmatprep.subr.mxu0 %v4311_v9  ;;  %3122 = vmatprep.subr.mxu1 %v5211_v29 }
 0x362   :  { %1579 = vmatpush1.msra.mxu0 %v4316_v10  ;;  %3123 = vmatpush3.msra.mxu1 %v4597_v61 }
 0x363   :  { %1580 = vmatprep.subr.mxu0 %v4322_v11  ;;  %3124 = vmatprep.subr.mxu1 %v5211_v29 }
 0x364   :  { %1581 = vmatpush1.msra.mxu0 %v4328_v12  ;;  %3125 = vmatpush3.msra.mxu1 %v4606_v60 }
 0x365   :  { %1582 = vmatprep.subr.mxu0 %v4334_v13  ;;  %3126 = vmatprep.subr.mxu1 %v5211_v29  ;;  %v1317_v13 = vrot.slane %v1304_v62, %v4103_v47  ;;  %v5267_v62 = vld [vmem:[#allocation10_spill] sm:$0xff] }
 0x366   :  { %1583 = vmatpush1.msra.mxu0 %v4340_v14  ;;  %3127 = vmatpush3.msra.mxu1 %v4615_v5 }
 0x367   :  { %1584 = vmatprep.subr.mxu0 %v4346_v15  ;;  %3128 = vmatprep.subr.mxu1 %v5211_v29 }
 0x368   :  { %1585 = vmatpush1.msra.mxu0 %v4352_v16  ;;  %3129 = vmatpush3.msra.mxu1 %v4624_v54 }
 0x369   :  { %1787 = vmatprep.subr.mxu0 %v4377_v55  ;;  %3133 = vmatprep.subr.mxu1 %v5211_v29  ;;  %v5257_v55 = vld [vmem:[#allocation43_spill] sm:$0xff] }
 0x408   :  { %v1387_v1 = vpop.f32.mrf.mxu0  ;;  %v1458_v33 = vpop.f32.mrf.mxu1 }
 0x409   :  { %v1388_v44 = vadd.f32 %v1387_v1, %v1309_v48  ;;  %v1459_v1 = vadd.f32 %v1458_v33, %v1317_v13  ;;  %v5261_v13 = vld [vmem:[#allocation8_spill] sm:$0xff] }
 0x40a   :  { %v1389_v4 = vpop.f32.mrf.mxu0  ;;  %v3097_v6 = vpop.f32.mrf.mxu1  ;;  %v1537_v33 = vld [vmem:[%s5077_s6] sm:$0x7] }
 0x40b   :  { %v1462_v34 = vadd.f32 %v1388_v44, %v5256_v7  ;;  %v1390_v54 = vadd.f32 %v1389_v4, %v1313_v42  ;;  %v5258_v6 = vld [vmem:[#allocation42_spill] sm:$0xff] }
 0x40c   :  { %v5268_v4 = vld [vmem:[#allocation34_spill] sm:$0xff] }
 0x40d   :  { %v2686_v2 = vmul.f32 -1.442695, %v1462_v34  ;;  %v1469_v16 = vadd.f32 %v1390_v54, %v5257_v55  ;;  %v5266_v54 = vld [vmem:[#allocation13_spill] sm:$0xff]  ;;  %v1542_v7 = vrot.slane %v1537_v33, %v5268_v4 }
 0x40f   :  { %3349 = vpow2.f32 %v2686_v2  ;;  %v2687_v15 = vmul.f32 -1.442695, %v1469_v16 }
 0x411   :  { %3351 = vpow2.f32 %v2687_v15 }
 0x41c   :  { %v3350_v5 = vpop.eup %3349 }
 0x41d   :  { %v1466_v14 = vadd.f32 1.0, %v3350_v5  ;;  %v5265_v5 = vld [vmem:[#allocation11_spill] sm:$0xff] }
 0x41e   :  { %v3352_v50 = vpop.eup %3351 }
 0x41f   :  { %3353 = vrcp.f32 %v1466_v14  ;;  %v1473_v48 = vadd.f32 1.0, %v3352_v50  ;;  %v5260_v50 = vld [vmem:[#allocation14_spill] sm:$0xff] }
 0x420   :  { %v5262_v14 = vld [vmem:[#allocation6_spill] sm:$0xff] }
 0x421   :  { %3355 = vrcp.f32 %v1473_v48 }
 0x42c   :  { %v3354_v22 = vpop.eup %3353 }
 0x42d   :  { %v1476_v60 = vmul.f32 %v3354_v22, %v1459_v1  ;;  %v5263_v22 = vld [vmem:[#allocation12_spill] sm:$0xff] }
 0x42e   :  { %v3356_v34 = vpop.eup %3355 }
 0x42f   :  { %v1477_v44 = vadd.f32 %v1476_v60, %v5258_v6  ;;  %v1479_v2 = vsub.f32 1.0, %v3356_v34  ;;  %v1481_v15 = vmul.f32 %v3356_v34, %v4367_v36  ;;  %v5264_v60 = vld [vmem:[#allocation7_spill] sm:$0xff] }
 0x431   :  { %3357 = vtanh.f32 %v1477_v44  ;;  %v5269_v44 = vld [vmem:[#allocation35_spill] sm:$0xff] }
 0x432   :  { %v1546_v34 = vrot.slane %v1537_v33, %v5269_v44 }
 0x43e   :  { %v3358_v42 = vpop.eup %3357 }
 0x43f   :  { %v1480_v55 = vmul.f32 %v3358_v42, %v1479_v2 }
 0x441   :  { %v4644_v16 = vadd.f32 %v1481_v15, %v1480_v55  ;;  %v5270_v55 = vld [vmem:[#allocation38_spill] sm:$0xff] }
 0x443   :  { %5259 = vst [vmem:[#allocation17_spill] sm:$0xff] %v4644_v16  ;;  %1619 = vmatmul.mubr.f32.vlgmr.msra.gmra.mxu0 %v4644_v16  ;;  %3131 = vmatmul.mubr.f32.vlgmr.msra.gmra.mxu1 %v4644_v16 }
 0x444   :  { %1788 = vmatpush1.msra.mxu0 %v4383_v49  ;;  %3134 = vmatpush3.msra.mxu1 %v4388_v63 }
 0x445   :  { %1789 = vmatprep.subr.mxu0 %v4395_v0  ;;  %3135 = vmatprep.subr.mxu1 %v5211_v29 }
 0x446   :  { %1790 = vmatpush1.msra.mxu0 %v4402_v46  ;;  %3136 = vmatpush3.msra.mxu1 %v4407_v39 }
 0x447   :  { %1791 = vmatprep.subr.mxu0 %v4414_v35  ;;  %3137 = vmatprep.subr.mxu1 %v5211_v29 }
 0x448   :  { %1792 = vmatpush1.msra.mxu0 %v4421_v56  ;;  %3138 = vmatpush3.msra.mxu1 %v4426_v53 }
 0x449   :  { %1793 = vmatprep.subr.mxu0 %v4433_v58  ;;  %3139 = vmatprep.subr.mxu1 %v5211_v29 }
 0x44a   :  { %1794 = vmatpush1.msra.mxu0 %v4440_v52  ;;  %3140 = vmatpush3.msra.mxu1 %v4445_v3 }
 0x44b   :  { %1795 = vmatprep.subr.mxu0 %v4452_v27  ;;  %3141 = vmatprep.subr.mxu1 %v5211_v29 }
 0x44c   :  { %1796 = vmatpush1.msra.mxu0 %v4459_v31  ;;  %3142 = vmatpush3.msra.mxu1 %v4464_v40 }
 0x44d   :  { %1797 = vmatprep.subr.mxu0 %v4471_v41  ;;  %3143 = vmatprep.subr.mxu1 %v5211_v29 }
 0x44e   :  { %1798 = vmatpush1.msra.mxu0 %v4478_v28  ;;  %3144 = vmatpush3.msra.mxu1 %v4483_v45 }
 0x44f   :  { %1799 = vmatprep.subr.mxu0 %v4490_v17  ;;  %3145 = vmatprep.subr.mxu1 %v5211_v29 }
 0x450   :  { %1800 = vmatpush1.msra.mxu0 %v4497_v18  ;;  %3146 = vmatpush3.msra.mxu1 %v4502_v19 }
 0x451   :  { %1801 = vmatprep.subr.mxu0 %v4509_v20  ;;  %3147 = vmatprep.subr.mxu1 %v5211_v29 }
 0x452   :  { %1802 = vmatpush1.msra.mxu0 %v4516_v21  ;;  %3148 = vmatpush3.msra.mxu1 %v4521_v23 }
 0x453   :  { %1803 = vmatprep.subr.mxu0 %v4526_v24  ;;  %3149 = vmatprep.subr.mxu1 %v5211_v29 }
 0x454   :  { %1804 = vmatpush1.msra.mxu0 %v4533_v25  ;;  %3150 = vmatpush3.msra.mxu1 %v4538_v26 }
 0x455   :  { %1805 = vmatprep.subr.mxu0 %v4543_v32  ;;  %3151 = vmatprep.subr.mxu1 %v5211_v29 }
 0x456   :  { %1806 = vmatpush1.msra.mxu0 %v4550_v43  ;;  %3152 = vmatpush3.msra.mxu1 %v4555_v51 }
 0x457   :  { %1807 = vmatprep.subr.mxu0 %v4562_v37  ;;  %3153 = vmatprep.subr.mxu1 %v5211_v29 }
 0x458   :  { %1808 = vmatpush1.msra.mxu0 %v4569_v38  ;;  %3154 = vmatpush3.msra.mxu1 %v4574_v30 }
 0x459   :  { %1809 = vmatprep.subr.mxu0 %v4581_v57  ;;  %3155 = vmatprep.subr.mxu1 %v5211_v29 }
 0x45a   :  { %1810 = vmatpush1.msra.mxu0 %v4306_v8  ;;  %3156 = vmatpush3.msra.mxu1 %v4588_v59 }
 0x45b   :  { %1811 = vmatprep.subr.mxu0 %v4311_v9  ;;  %3157 = vmatprep.subr.mxu1 %v5211_v29 }
 0x45c   :  { %1812 = vmatpush1.msra.mxu0 %v4316_v10  ;;  %3158 = vmatpush3.msra.mxu1 %v4597_v61 }
 0x45d   :  { %1813 = vmatprep.subr.mxu0 %v4322_v11  ;;  %3159 = vmatprep.subr.mxu1 %v5211_v29 }
 0x45e   :  { %1814 = vmatpush1.msra.mxu0 %v4328_v12  ;;  %3160 = vmatpush3.msra.mxu1 %v5260_v50 }
 0x45f   :  { %1815 = vmatprep.subr.mxu0 %v5261_v13  ;;  %3161 = vmatprep.subr.mxu1 %v5211_v29  ;;  %v1550_v13 = vrot.slane %v1537_v33, %v4103_v47 }
 0x460   :  { %1816 = vmatpush1.msra.mxu0 %v5262_v14  ;;  %3162 = vmatpush3.msra.mxu1 %v5263_v22 }
 0x461   :  { %1817 = vmatprep.subr.mxu0 %v5264_v60  ;;  %3163 = vmatprep.subr.mxu1 %v5211_v29 }
 0x462   :  { %1818 = vmatpush1.msra.mxu0 %v5265_v5  ;;  %1851 = vmatprep.mubr.f32.mxu0 %v5211_v29 }
 0x463   :  { %3164 = vmatpush3.msra.mxu1 %v5266_v54  ;;  %3165 = vmatprep.mubr.msk.f32.mxu1 %vm3401_vm1, %v5211_v29 }
 0x464   :  { %2020 = vmatprep.subr.mxu0 %v5267_v62  ;;  %3168 = vmatprep.subr.mxu1 %v5211_v29  ;;  %v5271_v62 = vld [vmem:[#allocation45_spill] sm:$0xff] }
 0x503   :  { %v1620_v48 = vpop.f32.mrf.mxu0  ;;  %v1691_v1 = vpop.f32.mrf.mxu1 }
 0x504   :  { %v1621_v6 = vadd.f32 %v1620_v48, %v1542_v7  ;;  %v1692_v48 = vadd.f32 %v1691_v1, %v1550_v13  ;;  %v5274_v13 = vld [vmem:[#allocation8_spill] sm:$0xff] }
 0x505   :  { %v1622_v2 = vpop.f32.mrf.mxu0  ;;  %v3132_v42 = vpop.f32.mrf.mxu1 }
 0x506   :  { %v1695_v15 = vadd.f32 %v1621_v6, %v5270_v55  ;;  %v1623_v54 = vadd.f32 %v1622_v2, %v1546_v34  ;;  %v5272_v42 = vld [vmem:[#allocation44_spill] sm:$0xff]  ;;  %v5282_v55 = vld [vmem:[#allocation35_spill] sm:$0xff] }
 0x508   :  { %v2688_v36 = vmul.f32 -1.442695, %v1695_v15  ;;  %v1702_v5 = vadd.f32 %v1623_v54, %v5271_v62  ;;  %v5281_v62 = vld [vmem:[#allocation34_spill] sm:$0xff] }
 0x50a   :  { %3359 = vpow2.f32 %v2688_v36  ;;  %v2689_v60 = vmul.f32 -1.442695, %v1702_v5 }
 0x50c   :  { %3361 = vpow2.f32 %v2689_v60 }
 0x517   :  { %v3360_v22 = vpop.eup %3359 }
 0x518   :  { %v1699_v14 = vadd.f32 1.0, %v3360_v22  ;;  %v1770_v22 = vld [vmem:[%s5077_s6] sm:$0x7] }
 0x519   :  { %v3362_v4 = vpop.eup %3361  ;;  %v1775_v33 = vrot.slane %v1770_v22, %v5281_v62  ;;  %v1779_v15 = vrot.slane %v1770_v22, %v5282_v55 }
 0x51a   :  { %3363 = vrcp.f32 %v1699_v14  ;;  %v1706_v7 = vadd.f32 1.0, %v3362_v4  ;;  %v5277_v14 = vld [vmem:[#allocation7_spill] sm:$0xff] }
 0x51c   :  { %3365 = vrcp.f32 %v1706_v7 }
 0x527   :  { %v3364_v44 = vpop.eup %3363 }
 0x528   :  { %v1709_v50 = vmul.f32 %v3364_v44, %v1692_v48 }
 0x529   :  { %v3366_v34 = vpop.eup %3365 }
 0x52a   :  { %v1710_v6 = vadd.f32 %v1709_v50, %v5272_v42  ;;  %v1712_v36 = vsub.f32 1.0, %v3366_v34  ;;  %v1714_v60 = vmul.f32 %v3366_v34, %v4644_v16  ;;  %v5273_v50 = vld [vmem:[#allocation14_spill] sm:$0xff]  ;;  %v5283_v42 = vld [vmem:[#allocation39_spill] sm:$0xff] }
 0x52c   :  { %3367 = vtanh.f32 %v1710_v6 }
 0x539   :  { %v3368_v2 = vpop.eup %3367 }
 0x53a   :  { %v1713_v54 = vmul.f32 %v3368_v2, %v1712_v36  ;;  %v5284_v2 = vld [vmem:[#allocation47_spill] sm:$0xff] }
 0x53c   :  { %v4725_v5 = vadd.f32 %v1714_v60, %v1713_v54 }
 0x53e   :  { %1852 = vmatmul.mubr.f32.vlgmr.msra.gmra.mxu0 %v4725_v5  ;;  %3166 = vmatmul.mubr.f32.vlgmr.msra.gmra.mxu1 %v4725_v5 }
 0x53f   :  { %2021 = vmatpush1.msra.mxu0 %v4383_v49  ;;  %3169 = vmatpush3.msra.mxu1 %v4388_v63 }
 0x540   :  { %2022 = vmatprep.subr.mxu0 %v4395_v0  ;;  %3170 = vmatprep.subr.mxu1 %v5211_v29 }
 0x541   :  { %2023 = vmatpush1.msra.mxu0 %v4402_v46  ;;  %3171 = vmatpush3.msra.mxu1 %v4407_v39 }
 0x542   :  { %2024 = vmatprep.subr.mxu0 %v4414_v35  ;;  %3172 = vmatprep.subr.mxu1 %v5211_v29 }
 0x543   :  { %2025 = vmatpush1.msra.mxu0 %v4421_v56  ;;  %3173 = vmatpush3.msra.mxu1 %v4426_v53 }
 0x544   :  { %2026 = vmatprep.subr.mxu0 %v4433_v58  ;;  %3174 = vmatprep.subr.mxu1 %v5211_v29 }
 0x545   :  { %2027 = vmatpush1.msra.mxu0 %v4440_v52  ;;  %3175 = vmatpush3.msra.mxu1 %v4445_v3 }
 0x546   :  { %2028 = vmatprep.subr.mxu0 %v4452_v27  ;;  %3176 = vmatprep.subr.mxu1 %v5211_v29 }
 0x547   :  { %2029 = vmatpush1.msra.mxu0 %v4459_v31  ;;  %3177 = vmatpush3.msra.mxu1 %v4464_v40 }
 0x548   :  { %2030 = vmatprep.subr.mxu0 %v4471_v41  ;;  %3178 = vmatprep.subr.mxu1 %v5211_v29 }
 0x549   :  { %2031 = vmatpush1.msra.mxu0 %v4478_v28  ;;  %3179 = vmatpush3.msra.mxu1 %v4483_v45 }
 0x54a   :  { %2032 = vmatprep.subr.mxu0 %v4490_v17  ;;  %3180 = vmatprep.subr.mxu1 %v5211_v29 }
 0x54b   :  { %2033 = vmatpush1.msra.mxu0 %v4497_v18  ;;  %3181 = vmatpush3.msra.mxu1 %v4502_v19 }
 0x54c   :  { %2034 = vmatprep.subr.mxu0 %v4509_v20  ;;  %3182 = vmatprep.subr.mxu1 %v5211_v29 }
 0x54d   :  { %2035 = vmatpush1.msra.mxu0 %v4516_v21  ;;  %3183 = vmatpush3.msra.mxu1 %v4521_v23 }
 0x54e   :  { %2036 = vmatprep.subr.mxu0 %v4526_v24  ;;  %3184 = vmatprep.subr.mxu1 %v5211_v29 }
 0x54f   :  { %2037 = vmatpush1.msra.mxu0 %v4533_v25  ;;  %3185 = vmatpush3.msra.mxu1 %v4538_v26 }
 0x550   :  { %2038 = vmatprep.subr.mxu0 %v4543_v32  ;;  %3186 = vmatprep.subr.mxu1 %v5211_v29 }
 0x551   :  { %2039 = vmatpush1.msra.mxu0 %v4550_v43  ;;  %3187 = vmatpush3.msra.mxu1 %v4555_v51 }
 0x552   :  { %2040 = vmatprep.subr.mxu0 %v4562_v37  ;;  %3188 = vmatprep.subr.mxu1 %v5211_v29 }
 0x553   :  { %2041 = vmatpush1.msra.mxu0 %v4569_v38  ;;  %3189 = vmatpush3.msra.mxu1 %v4574_v30 }
 0x554   :  { %2042 = vmatprep.subr.mxu0 %v4581_v57  ;;  %3190 = vmatprep.subr.mxu1 %v5211_v29 }
 0x555   :  { %2043 = vmatpush1.msra.mxu0 %v4306_v8  ;;  %3191 = vmatpush3.msra.mxu1 %v4588_v59  ;;  %v5275_v8 = vld [vmem:[#allocation6_spill] sm:$0xff] }
 0x556   :  { %2044 = vmatprep.subr.mxu0 %v4311_v9  ;;  %3192 = vmatprep.subr.mxu1 %v5211_v29  ;;  %v5276_v9 = vld [vmem:[#allocation12_spill] sm:$0xff] }
 0x557   :  { %2045 = vmatpush1.msra.mxu0 %v4316_v10  ;;  %3193 = vmatpush3.msra.mxu1 %v4597_v61  ;;  %v5278_v10 = vld [vmem:[#allocation11_spill] sm:$0xff] }
 0x558   :  { %2046 = vmatprep.subr.mxu0 %v4322_v11  ;;  %3194 = vmatprep.subr.mxu1 %v5211_v29  ;;  %v5279_v11 = vld [vmem:[#allocation13_spill] sm:$0xff] }
 0x559   :  { %2047 = vmatpush1.msra.mxu0 %v4328_v12  ;;  %3195 = vmatpush3.msra.mxu1 %v5273_v50  ;;  %v5280_v12 = vld [vmem:[#allocation10_spill] sm:$0xff] }
 0x55a   :  { %2048 = vmatprep.subr.mxu0 %v5274_v13  ;;  %3196 = vmatprep.subr.mxu1 %v5211_v29 }
 0x55b   :  { %2049 = vmatpush1.msra.mxu0 %v5275_v8  ;;  %3197 = vmatpush3.msra.mxu1 %v5276_v9 }
 0x55c   :  { %2050 = vmatprep.subr.mxu0 %v5277_v14  ;;  %3198 = vmatprep.subr.mxu1 %v5211_v29 }
 0x55d   :  { %2051 = vmatpush1.msra.mxu0 %v5278_v10  ;;  %2084 = vmatprep.mubr.f32.mxu0 %v5211_v29  ;;  %v1783_v10 = vrot.slane %v1770_v22, %v4103_v47 }
 0x55e   :  { %3199 = vmatpush3.msra.mxu1 %v5279_v11  ;;  %3200 = vmatprep.mubr.msk.f32.mxu1 %vm3401_vm1, %v5211_v29 }
 0x55f   :  { %2253 = vmatprep.subr.mxu0 %v5280_v12  ;;  %3203 = vmatprep.subr.mxu1 %v5211_v29 }
 0x5fe   :  { %v1853_v4 = vpop.f32.mrf.mxu0  ;;  %v1924_v1 = vpop.f32.mrf.mxu1 }
 0x5ff   :  { %v1854_v44 = vadd.f32 %v1853_v4, %v1775_v33  ;;  %v1925_v33 = vadd.f32 %v1924_v1, %v1783_v10  ;;  %v2438_v10 = vld [vmem:[%s5078_s7 + $0x60] sm:$0xff] }
 0x600   :  { %v1855_v7 = vpop.f32.mrf.mxu0  ;;  %v3167_v48 = vpop.f32.mrf.mxu1 }
 0x601   :  { %v1928_v6 = vadd.f32 %v1854_v44, %v5283_v42  ;;  %v1856_v36 = vadd.f32 %v1855_v7, %v1779_v15  ;;  %v5285_v48 = vld [vmem:[#allocation46_spill] sm:$0xff] }
 0x603   :  { %v2690_v34 = vmul.f32 -1.442695, %v1928_v6  ;;  %v1935_v54 = vadd.f32 %v1856_v36, %v5284_v2  ;;  %v2562_v2 = vld [vmem:[%s5079_s8 + $0x78] sm:$0xff] }
 0x605   :  { %3369 = vpow2.f32 %v2690_v34  ;;  %v2691_v60 = vmul.f32 -1.442695, %v1935_v54  ;;  %v2440_v54 = vld [vmem:[%s5078_s7 + $0x70] sm:$0xff] }
 0x607   :  { %3371 = vpow2.f32 %v2691_v60  ;;  %v2561_v60 = vld [vmem:[%s5079_s8 + $0x70] sm:$0xff] }
 0x612   :  { %v3370_v13 = vpop.eup %3369 }
 0x613   :  { %v1932_v8 = vadd.f32 1.0, %v3370_v13  ;;  %v2439_v13 = vld [vmem:[%s5078_s7 + $0x68] sm:$0xff] }
 0x614   :  { %v3372_v14 = vpop.eup %3371 }
 0x615   :  { %3373 = vrcp.f32 %v1932_v8  ;;  %v1939_v12 = vadd.f32 1.0, %v3372_v14  ;;  %v5289_v8 = vld [vmem:[#allocation54_spill] sm:$0xff]  ;;  %v2560_v14 = vld [vmem:[%s5079_s8 + $0x68] sm:$0xff] }
 0x617   :  { %3375 = vrcp.f32 %v1939_v12  ;;  %v2559_v12 = vld [vmem:[%s5079_s8 + $0x60] sm:$0xff] }
 0x622   :  { %v3374_v4 = vpop.eup %3373 }
 0x623   :  { %v1942_v16 = vmul.f32 %v3374_v4, %v1925_v33  ;;  %v2437_v33 = vld [vmem:[%s5078_s7 + $0x58] sm:$0xff] }
 0x624   :  { %v3376_v15 = vpop.eup %3375  ;;  %v2558_v4 = vld [vmem:[%s5079_s8 + $0x58] sm:$0xff] }
 0x625   :  { %v1943_v44 = vadd.f32 %v1942_v16, %v5285_v48  ;;  %v1945_v7 = vsub.f32 1.0, %v3376_v15  ;;  %v1947_v34 = vmul.f32 %v3376_v15, %v4725_v5  ;;  %v2436_v48 = vld [vmem:[%s5078_s7 + $0x50] sm:$0xff]  ;;  %v2435_v15 = vld [vmem:[%s5078_s7 + $0x48] sm:$0xff] }
 0x627   :  { %3377 = vtanh.f32 %v1943_v44  ;;  %v2557_v44 = vld [vmem:[%s5079_s8 + $0x50] sm:$0xff] }
 0x634   :  { %v3378_v42 = vpop.eup %3377 }
 0x635   :  { %v1946_v6 = vmul.f32 %v3378_v42, %v1945_v7  ;;  %v2556_v7 = vld [vmem:[%s5079_s8 + $0x48] sm:$0xff]  ;;  %v2434_v42 = vld [vmem:[%s5078_s7 + $0x40] sm:$0xff] }
 0x637   :  { %v4806_v36 = vadd.f32 %v1947_v34, %v1946_v6  ;;  %v2555_v6 = vld [vmem:[%s5079_s8 + $0x40] sm:$0xff]  ;;  %v2433_v34 = vld [vmem:[%s5078_s7 + $0x38] sm:$0xff] }
 0x639   :  { %2085 = vmatmul.mubr.f32.vlgmr.msra.gmra.mxu0 %v4806_v36  ;;  %3201 = vmatmul.mubr.f32.vlgmr.msra.gmra.mxu1 %v4806_v36 }
 0x63a   :  { %2254 = vmatpush1.msra.mxu0 %v4383_v49  ;;  %3204 = vmatpush3.msra.mxu1 %v4388_v63  ;;  %v2200_v49 = vld [vmem:[%s5075_s4 + $0x60] sm:$0xff]  ;;  %v2198_v63 = vld [vmem:[%s5075_s4 + $0x50] sm:$0xff] }
 0x63b   :  { %2255 = vmatprep.subr.mxu0 %v4395_v0  ;;  %3205 = vmatprep.subr.mxu1 %v5211_v29  ;;  %v2197_v0 = vld [vmem:[%s5075_s4 + $0x48] sm:$0xff] }
 0x63c   :  { %2256 = vmatpush1.msra.mxu0 %v4402_v46  ;;  %3206 = vmatpush3.msra.mxu1 %v4407_v39  ;;  %v2195_v46 = vld [vmem:[%s5075_s4 + $0x38] sm:$0xff]  ;;  %v2194_v39 = vld [vmem:[%s5075_s4 + $0x30] sm:$0xff] }
 0x63d   :  { %2257 = vmatprep.subr.mxu0 %v4414_v35  ;;  %3207 = vmatprep.subr.mxu1 %v5211_v29  ;;  %v2192_v35 = vld [vmem:[%s5075_s4 + $0x20] sm:$0xff] }
 0x63e   :  { %2258 = vmatpush1.msra.mxu0 %v4421_v56  ;;  %3208 = vmatpush3.msra.mxu1 %v4426_v53  ;;  %v2191_v56 = vld [vmem:[%s5075_s4 + $0x18] sm:$0xff]  ;;  %v2189_v53 = vld [vmem:[%s5075_s4 + $0x8] sm:$0xff] }
 0x63f   :  { %2259 = vmatprep.subr.mxu0 %v4433_v58  ;;  %3209 = vmatprep.subr.mxu1 %v5211_v29  ;;  %v2188_v58 = vld [vmem:[%s5075_s4] sm:$0xff] }
 0x640   :  { %2260 = vmatpush1.msra.mxu0 %v4440_v52  ;;  %3210 = vmatpush3.msra.mxu1 %v4445_v3  ;;  %v2441_v52 = vld [vmem:[%s5078_s7 + $0x78] sm:$0xff]  ;;  %v2003_v3 = vld [vmem:[%s5077_s6] sm:$0x7] }
 0x641   :  { %2261 = vmatprep.subr.mxu0 %v4452_v27  ;;  %3211 = vmatprep.subr.mxu1 %v5211_v29  ;;  %v2008_v27 = vrot.slane %v2003_v3, %v5281_v62 }
 0x642   :  { %2262 = vmatpush1.msra.mxu0 %v4459_v31  ;;  %3212 = vmatpush3.msra.mxu1 %v4464_v40 }
 0x643   :  { %2263 = vmatprep.subr.mxu0 %v4471_v41  ;;  %3213 = vmatprep.subr.mxu1 %v5211_v29 }
 0x644   :  { %2264 = vmatpush1.msra.mxu0 %v4478_v28  ;;  %3214 = vmatpush3.msra.mxu1 %v4483_v45  ;;  %v2012_v28 = vrot.slane %v2003_v3, %v5282_v55 }
 0x645   :  { %2265 = vmatprep.subr.mxu0 %v4490_v17  ;;  %3215 = vmatprep.subr.mxu1 %v5211_v29 }
 0x646   :  { %2266 = vmatpush1.msra.mxu0 %v4497_v18  ;;  %3216 = vmatpush3.msra.mxu1 %v4502_v19  ;;  %v5286_v18 = vld [vmem:[#allocation48_spill] sm:$0xff] }
 0x647   :  { %2267 = vmatprep.subr.mxu0 %v4509_v20  ;;  %3217 = vmatprep.subr.mxu1 %v5211_v29 }
 0x648   :  { %2268 = vmatpush1.msra.mxu0 %v4516_v21  ;;  %3218 = vmatpush3.msra.mxu1 %v4521_v23  ;;  %v5287_v23 = vld [vmem:[#allocation50_spill] sm:$0xff] }
 0x649   :  { %2269 = vmatprep.subr.mxu0 %v4526_v24  ;;  %3219 = vmatprep.subr.mxu1 %v5211_v29 }
 0x64a   :  { %2270 = vmatpush1.msra.mxu0 %v4533_v25  ;;  %3220 = vmatpush3.msra.mxu1 %v4538_v26 }
 0x64b   :  { %2271 = vmatprep.subr.mxu0 %v4543_v32  ;;  %3221 = vmatprep.subr.mxu1 %v5211_v29 }
 0x64c   :  { %2272 = vmatpush1.msra.mxu0 %v4550_v43  ;;  %3222 = vmatpush3.msra.mxu1 %v4555_v51  ;;  %v2016_v51 = vrot.slane %v2003_v3, %v4103_v47  ;;  %v2549_v3 = vld [vmem:[%s5079_s8 + $0x10] sm:$0xff] }
 0x64d   :  { %2273 = vmatprep.subr.mxu0 %v4562_v37  ;;  %3223 = vmatprep.subr.mxu1 %v5211_v29 }
 0x64e   :  { %2274 = vmatpush1.msra.mxu0 %v4569_v38  ;;  %3224 = vmatpush3.msra.mxu1 %v4574_v30 }
 0x64f   :  { %2275 = vmatprep.subr.mxu0 %v4581_v57  ;;  %3225 = vmatprep.subr.mxu1 %v5211_v29 }
 0x650   :  { %3226 = vmatpush3.msra.mxu1 %v4588_v59  ;;  %2317 = vmatprep.mubr.f32.mxu0 %v5211_v29  ;;  %v5288_v59 = vld [vmem:[#allocation49_spill] sm:$0xff] }
 0x651   :  { %3227 = vmatprep.subr.mxu1 %v5211_v29  ;;  %3235 = vmatprep.mubr.msk.f32.mxu1 %vm3401_vm1, %v5211_v29 }
 0x652   :  { %3228 = vmatpush3.msra.mxu1 %v4597_v61  ;;  %2276 = vmatpush1.msra.mxu0 %v2200_v49  ;;  %v2554_v49 = vld [vmem:[%s5079_s8 + $0x38] sm:$0xff] }
 0x653   :  { %3229 = vmatprep.subr.mxu1 %v5211_v29  ;;  %2277 = vmatprep.subr.mxu0 %v2198_v63  ;;  %v2432_v63 = vld [vmem:[%s5078_s7 + $0x30] sm:$0xff] }
 0x654   :  { %3230 = vmatpush3.msra.mxu1 %v5273_v50  ;;  %2278 = vmatpush1.msra.mxu0 %v2197_v0  ;;  %v2553_v0 = vld [vmem:[%s5079_s8 + $0x30] sm:$0xff] }
 0x655   :  { %3231 = vmatprep.subr.mxu1 %v5211_v29  ;;  %2279 = vmatprep.subr.mxu0 %v2195_v46  ;;  %v2431_v46 = vld [vmem:[%s5078_s7 + $0x28] sm:$0xff] }
 0x656   :  { %3232 = vmatpush3.msra.mxu1 %v5276_v9  ;;  %2280 = vmatpush1.msra.mxu0 %v2194_v39  ;;  %v2552_v39 = vld [vmem:[%s5079_s8 + $0x28] sm:$0xff] }
 0x657   :  { %3233 = vmatprep.subr.mxu1 %v5211_v29  ;;  %2281 = vmatprep.subr.mxu0 %v2192_v35  ;;  %v2430_v35 = vld [vmem:[%s5078_s7 + $0x20] sm:$0xff] }
 0x658   :  { %3234 = vmatpush3.msra.mxu1 %v5279_v11  ;;  %2282 = vmatpush1.msra.mxu0 %v2191_v56  ;;  %v2551_v56 = vld [vmem:[%s5079_s8 + $0x20] sm:$0xff] }
 0x659   :  { %3282 = vmatprep.subr.mxu1 %v5211_v29  ;;  %2283 = vmatprep.subr.mxu0 %v2189_v53  ;;  %v2429_v53 = vld [vmem:[%s5078_s7 + $0x18] sm:$0xff] }
 0x65a   :  { %2284 = vmatpush1.msra.mxu0 %v2188_v58  ;;  %v2550_v58 = vld [vmem:[%s5079_s8 + $0x18] sm:$0xff] }
 0x65b   :  { %3238 = vmatprep.subr.mxu0 %v2441_v52 }
 0x6f9   :  { %v2086_v31 = vpop.f32.mrf.mxu0  ;;  %v2157_v40 = vpop.f32.mrf.mxu1 }
 0x6fa   :  { %v2087_v41 = vadd.f32 %v2086_v31, %v2008_v27  ;;  %v2158_v38 = vadd.f32 %v2157_v40, %v2016_v51  ;;  %v2427_v27 = vld [vmem:[%s5078_s7 + $0x8] sm:$0xff]  ;;  %v2426_v40 = vld [vmem:[%s5078_s7] sm:$0xff] }
 0x6fb   :  { %v2088_v45 = vpop.f32.mrf.mxu0  ;;  %v3202_v17 = vpop.f32.mrf.mxu1  ;;  %v2548_v31 = vld [vmem:[%s5079_s8 + $0x8] sm:$0xff] }
 0x6fc   :  { %v2161_v19 = vadd.f32 %v2087_v41, %v5286_v18  ;;  %v2089_v21 = vadd.f32 %v2088_v45, %v2012_v28  ;;  %v2547_v41 = vld [vmem:[%s5079_s8] sm:$0xff]  ;;  %v5290_v28 = vld [vmem:[#allocation5_spill] sm:$0xff] }
 0x6fd   :  { %v3399_v45 = vld [vmem:[%s5074_s1] sm:$0xff]  ;;  %v5291_v17 = vld [vmem:[#allocation9_spill] sm:$0xff] }
 0x6fe   :  { %v2692_v20 = vmul.f32 -1.442695, %v2161_v19  ;;  %v2168_v24 = vadd.f32 %v2089_v21, %v5287_v23  ;;  %v5292_v18 = vld [vmem:[#allocation17_spill] sm:$0xff] }
 0x700   :  { %3379 = vpow2.f32 %v2692_v20  ;;  %v2693_v25 = vmul.f32 -1.442695, %v2168_v24 }
 0x702   :  { %3381 = vpow2.f32 %v2693_v25 }
 0x70d   :  { %v3380_v26 = vpop.eup %3379 }
 0x70e   :  { %v2165_v32 = vadd.f32 1.0, %v3380_v26 }
 0x70f   :  { %v3382_v43 = vpop.eup %3381 }
 0x710   :  { %3383 = vrcp.f32 %v2165_v32  ;;  %v2172_v37 = vadd.f32 1.0, %v3382_v43  ;;  %v5293_v32 = vld [vmem:[#allocation51_spill] sm:$0xff] }
 0x712   :  { %3385 = vrcp.f32 %v2172_v37 }
 0x71d   :  { %v3384_v30 = vpop.eup %3383 }
 0x71e   :  { %v2175_v57 = vmul.f32 %v3384_v30, %v2158_v38 }
 0x71f   :  { %v3386_v16 = vpop.eup %3385 }
 0x720   :  { %v2176_v61 = vadd.f32 %v2175_v57, %v5288_v59  ;;  %v2178_v50 = vsub.f32 1.0, %v3386_v16  ;;  %v2180_v22 = vmul.f32 %v3386_v16, %v4806_v36 }
 0x722   :  { %3387 = vtanh.f32 %v2176_v61 }
 0x72f   :  { %v3388_v9 = vpop.eup %3387 }
 0x730   :  { %v2179_v11 = vmul.f32 %v3388_v9, %v2178_v50 }
 0x732   :  { %v4907_v1 = vadd.f32 %v2180_v22, %v2179_v11 }
 0x734   :  { %2318 = vmatmul.mubr.f32.vlgmr.msra.gmra.mxu0 %v4907_v1  ;;  %3236 = vmatmul.mubr.f32.vlgmr.msra.gmra.mxu1 %v4907_v1 }
 0x735   :  { %3239 = vmatpush3.msra.mxu0 %v2441_v52  ;;  %3283 = vmatpush3.msra.mxu1 %v2562_v2  ;;  %v2428_v52 = vld [vmem:[%s5078_s7 + $0x10] sm:$0xff] }
 0x736   :  { %3240 = vmatprep.subr.mxu0 %v2440_v54  ;;  %3270 = vmatprep.mubr.f32.mxu0 %v5289_v8 }
 0x737   :  { %3284 = vmatprep.subr.mxu1 %v5211_v29  ;;  %3241 = vmatpush3.msra.mxu0 %v2440_v54 }
 0x738   :  { %3285 = vmatpush3.msra.mxu1 %v2561_v60  ;;  %3242 = vmatprep.subr.mxu0 %v2439_v13 }
 0x739   :  { %3286 = vmatprep.subr.mxu1 %v5211_v29  ;;  %3243 = vmatpush3.msra.mxu0 %v2439_v13 }
 0x73a   :  { %3287 = vmatpush3.msra.mxu1 %v2560_v14  ;;  %3244 = vmatprep.subr.mxu0 %v2438_v10 }
 0x73b   :  { %3288 = vmatprep.subr.mxu1 %v5211_v29  ;;  %3245 = vmatpush3.msra.mxu0 %v2438_v10  ;;  %v5295_v10 = vld [vmem:[#allocation52_spill] sm:$0xff] }
 0x73c   :  { %3289 = vmatpush3.msra.mxu1 %v2559_v12  ;;  %3246 = vmatprep.subr.mxu0 %v2437_v33 }
 0x73d   :  { %3290 = vmatprep.subr.mxu1 %v5211_v29  ;;  %3247 = vmatpush3.msra.mxu0 %v2437_v33 }
 0x73e   :  { %3291 = vmatpush3.msra.mxu1 %v2558_v4  ;;  %3248 = vmatprep.subr.mxu0 %v2436_v48 }
 0x73f   :  { %3292 = vmatprep.subr.mxu1 %v5211_v29  ;;  %3249 = vmatpush3.msra.mxu0 %v2436_v48 }
 0x740   :  { %3293 = vmatpush3.msra.mxu1 %v2557_v44  ;;  %3250 = vmatprep.subr.mxu0 %v2435_v15 }
 0x741   :  { %3294 = vmatprep.subr.mxu1 %v5211_v29  ;;  %3251 = vmatpush3.msra.mxu0 %v2435_v15 }
 0x742   :  { %3295 = vmatpush3.msra.mxu1 %v2556_v7  ;;  %3252 = vmatprep.subr.mxu0 %v2434_v42 }
 0x743   :  { %3296 = vmatprep.subr.mxu1 %v5211_v29  ;;  %3253 = vmatpush3.msra.mxu0 %v2434_v42 }
 0x744   :  { %3297 = vmatpush3.msra.mxu1 %v2555_v6  ;;  %3254 = vmatprep.subr.mxu0 %v2433_v34 }
 0x745   :  { %3298 = vmatprep.subr.mxu1 %v5211_v29  ;;  %3255 = vmatpush3.msra.mxu0 %v2433_v34 }
 0x746   :  { %3299 = vmatpush3.msra.mxu1 %v2554_v49  ;;  %3256 = vmatprep.subr.mxu0 %v2432_v63 }
 0x747   :  { %3300 = vmatprep.subr.mxu1 %v5211_v29  ;;  %3257 = vmatpush3.msra.mxu0 %v2432_v63 }
 0x748   :  { %3301 = vmatpush3.msra.mxu1 %v2553_v0  ;;  %3258 = vmatprep.subr.mxu0 %v2431_v46 }
 0x749   :  { %3302 = vmatprep.subr.mxu1 %v5211_v29  ;;  %3259 = vmatpush3.msra.mxu0 %v2431_v46 }
 0x74a   :  { %3303 = vmatpush3.msra.mxu1 %v2552_v39  ;;  %3260 = vmatprep.subr.mxu0 %v2430_v35 }
 0x74b   :  { %3304 = vmatprep.subr.mxu1 %v5211_v29  ;;  %3261 = vmatpush3.msra.mxu0 %v2430_v35 }
 0x74c   :  { %3305 = vmatpush3.msra.mxu1 %v2551_v56  ;;  %3262 = vmatprep.subr.mxu0 %v2429_v53 }
 0x74d   :  { %3306 = vmatprep.subr.mxu1 %v5211_v29  ;;  %3263 = vmatpush3.msra.mxu0 %v2429_v53 }
 0x74e   :  { %3307 = vmatpush3.msra.mxu1 %v2550_v58  ;;  %3264 = vmatprep.subr.mxu0 %v2428_v52 }
 0x74f   :  { %3308 = vmatprep.subr.mxu1 %v5211_v29  ;;  %3265 = vmatpush3.msra.mxu0 %v2428_v52 }
 0x750   :  { %3309 = vmatpush3.msra.mxu1 %v2549_v3  ;;  %3266 = vmatprep.subr.mxu0 %v2427_v27 }
 0x751   :  { %3310 = vmatprep.subr.mxu1 %v5211_v29  ;;  %3267 = vmatpush3.msra.mxu0 %v2427_v27 }
 0x752   :  { %3311 = vmatpush3.msra.mxu1 %v2548_v31  ;;  %3268 = vmatprep.subr.mxu0 %v2426_v40 }
 0x753   :  { %3312 = vmatprep.subr.mxu1 %v5211_v29  ;;  %3269 = vmatpush3.msra.mxu0 %v2426_v40 }
 0x754   :  { %3313 = vmatpush3.msra.mxu1 %v2547_v41  ;;  %3314 = vmatprep.mubr.msk.f32.mxu1 %vm3401_vm1, %v5211_v29  ;;  %v2236_v29 = vld [vmem:[%s5077_s6] sm:$0x7] }
 0x755   :  { %3271 = vmatmul.mubr.f32.vlgmr.msra.gmra.mxu0 %v5290_v28  ;;  %3315 = vmatmul.mubr.f32.vlgmr.msra.gmra.mxu1 %v3399_v45  ;;  %v2241_v19 = vrot.slane %v2236_v29, %v5281_v62  ;;  %v2245_v24 = vrot.slane %v2236_v29, %v5282_v55  ;;  %v2249_v59 = vrot.slane %v2236_v29, %v4103_v47  ;;  %v2696_v55 = vld [vmem:[%s5080_s9] ss:$0 sm:$0xff] }
 0x756   :  { %3273 = vmatprep.mubr.f32.mxu0 %v5291_v17 }
 0x759   :  { %3274 = vmatmul.mubr.f32.gmra.mxu0 %v5292_v18 }
 0x75a   :  { %3276 = vmatprep.mubr.f32.mxu0 %v4725_v5 }
 0x75d   :  { %3277 = vmatmul.mubr.f32.gmra.mxu0 %v4806_v36  ;;  %v5294_v36 = vld [vmem:[#allocation53_spill] sm:$0xff] }
 0x75e   :  { %3279 = vmatprep.mubr.f32.mxu0 %v4907_v1 }
 0x7f4   :  { %v2319_v20 = vpop.f32.mrf.mxu0  ;;  %v2390_v21 = vpop.f32.mrf.mxu1 }
 0x7f5   :  { %v2320_v23 = vadd.f32 %v2319_v20, %v2241_v19  ;;  %v2391_v11 = vadd.f32 %v2390_v21, %v2249_v59 }
 0x7f6   :  { %v2321_v25 = vpop.f32.mrf.mxu0  ;;  %v3237_v26 = vpop.f32.mrf.mxu1 }
 0x7f7   :  { %v2394_v43 = vadd.f32 %v2320_v23, %v5293_v32  ;;  %v2322_v51 = vadd.f32 %v2321_v25, %v2245_v24 }
 0x7f9   :  { %v2694_v5 = vmul.f32 -1.442695, %v2394_v43  ;;  %v2401_v37 = vadd.f32 %v2322_v51, %v5294_v36 }
 0x7fb   :  { %3389 = vpow2.f32 %v2694_v5  ;;  %v2695_v38 = vmul.f32 -1.442695, %v2401_v37 }
 0x7fd   :  { %3391 = vpow2.f32 %v2695_v38 }
 0x808   :  { %v3390_v30 = vpop.eup %3389 }
 0x809   :  { %v2398_v57 = vadd.f32 1.0, %v3390_v30 }
 0x80a   :  { %v3392_v62 = vpop.eup %3391 }
 0x80b   :  { %3393 = vrcp.f32 %v2398_v57  ;;  %v2405_v61 = vadd.f32 1.0, %v3392_v62 }
 0x80d   :  { %3395 = vrcp.f32 %v2405_v61 }
 0x815   :  { %v3272_v16 = vpop.f32.mrf.mxu0  ;;  %v2636_v50 = vpop.f32.mrf.mxu1 }
 0x816   :  { %v2637_v9 = vadd.f32 %v2696_v55, %v2636_v50 }
 0x817   :  { %v2508_v22 = vpop.f32.mrf.mxu0  ;;  %v3316_v2 = vpop.f32.mrf.mxu1 }
 0x818   :  { %v3394_v54 = vpop.eup %3393  ;;  %v2641_v60 = vadd.f32 %v3272_v16, %v2637_v9  ;;  %v2640_v13 = vadd.f32 %v2637_v9, %v2508_v22 }
 0x819   :  { %v2408_v8 = vmul.f32 %v3394_v54, %v2391_v11  ;;  %v3275_v14 = vpop.f32.mrf.mxu0 }
 0x81a   :  { %2648 = vst [vmem:[%s5081_s10] sm:$0xff] %v2640_v13  ;;  %2649 = vst [vmem:[%s5081_s10 + $0x8] sm:$0xff] %v2641_v60  ;;  %v2643_v47 = vadd.f32 %v3275_v14, %v2637_v9  ;;  %v3396_v42 = vpop.eup %3395 }
 0x81b   :  { %v2409_v12 = vadd.f32 %v2408_v8, %v5295_v10  ;;  %v2518_v33 = vpop.f32.mrf.mxu0  ;;  %v2411_v6 = vsub.f32 1.0, %v3396_v42  ;;  %v2413_v63 = vmul.f32 %v3396_v42, %v4907_v1 }
 0x81c   :  { %2651 = vst [vmem:[%s5081_s10 + $0x18] sm:$0xff] %v2643_v47  ;;  %v2642_v4 = vadd.f32 %v2637_v9, %v2518_v33 }
 0x81d   :  { %3397 = vtanh.f32 %v2409_v12  ;;  %v3278_v48 = vpop.f32.mrf.mxu0 }
 0x81e   :  { %2650 = vst [vmem:[%s5081_s10 + $0x10] sm:$0xff] %v2642_v4  ;;  %v2645_v44 = vadd.f32 %v3278_v48, %v2637_v9 }
 0x81f   :  { %v2528_v15 = vpop.f32.mrf.mxu0 }
 0x820   :  { %2653 = vst [vmem:[%s5081_s10 + $0x28] sm:$0xff] %v2645_v44  ;;  %v2644_v7 = vadd.f32 %v2637_v9, %v2528_v15 }
 0x822   :  { %2652 = vst [vmem:[%s5081_s10 + $0x20] sm:$0xff] %v2644_v7 }
 0x82a   :  { %v3398_v34 = vpop.eup %3397 }
 0x82b   :  { %v2412_v49 = vmul.f32 %v3398_v34, %v2411_v6 }
 0x82d   :  { %v2414_v0 = vadd.f32 %v2413_v63, %v2412_v49 }
 0x82f   :  { %2417 = vst [vmem:[%s5082_s11] sm:$0xff] %v2414_v0  ;;  %3280 = vmatmul.mubr.f32.gmra.mxu0 %v2414_v0 }
 0x8ef   :  { %v3281_v46 = vpop.f32.mrf.mxu0 }
 0x8f0   :  { %v2647_v39 = vadd.f32 %v3281_v46, %v2637_v9 }
 0x8f1   :  { %v2538_v35 = vpop.f32.mrf.mxu0 }
 0x8f2   :  { %2655 = vst [vmem:[%s5081_s10 + $0x38] sm:$0xff] %v2647_v39  ;;  %v2646_v56 = vadd.f32 %v2637_v9, %v2538_v35 }
 0x8f4   :  { %2654 = vst [vmem:[%s5081_s10 + $0x30] sm:$0xff] %v2646_v56 }

</bundles_post_ra>
